<compile_context>
chip_gen: v6e
topology: v6e:2x2x1
jax: 0.10.0
libtpu: 0.0.40
codegen_flags: <defaults>
</compile_context>

<pallas_src>
import numpy as np
import jax
import jax.numpy as jnp
from jax.experimental import pallas as pl
from jax.experimental.pallas import tpu as pltpu

# ---------------- hyper-params (synthetic, mirror module __init__) ------------
ATOM_FDIM = 16
BOND_FDIM = 24
HIDDEN = 32
DEPTH = 3            # args.depth
HID_PAD = 128        # lane-dense padded hidden width (sliced back to HIDDEN)

# per-tile capacities (MXU-row sized on v6e/v7x, sublane/lane aligned)
TILE_MOLS = 64       # multiple of 8 -> [TM, 128] f32 output stays vreg aligned
TILE_ATOMS = 256
TILE_BONDS = 256

# args.bias=False (W_i / W_h no bias; W_o always has bias)
# args.message_dropout = 0.0 -> dropout is identity (eval semantics)
# args.activation = 'ReLU'


# ------------------------------ Pallas kernel --------------------------------
def mpn_kernel(f_atoms_ref, f_bonds_ref, m_ref, a2b_ref, molcnt_ref, inv_ref,
               w_i_ref, w_h_ref, w_o_atom_ref, w_o_msg_ref, b_o_ref, out_ref):
    # refs (per molecule-tile, leading tile axis squeezed away by BlockSpec):
    #   f_atoms [TA, ATOM_FDIM] bf16   f_bonds [TB, BOND_FDIM] bf16
    #   M       [TB, TB]        bf16   A2B     [TA, TB]        bf16
    #   MOLCNT  [TM, TA]        bf16 (0/1 selection)
    #   INV     [TM, 1]         f32  (1 / a_size, 0 for padded mol slots)
    #   weights padded to HID_PAD output channels, bf16; b_o f32 [1, HID_PAD]
    bf16 = jnp.bfloat16
    f32 = jnp.float32

    # input = W_i(f_bonds); message = relu(input)
    # keep `inp` / `message` live in bf16 across the depth loop (vreg pressure)
    inp = jnp.dot(f_bonds_ref[...], w_i_ref[...],
                  preferred_element_type=f32).astype(bf16)        # [TB, HID_PAD]
    message = jnp.maximum(inp, 0.0)                               # bf16

    # depth-1 message passing steps, statically unrolled.
    # M = B2A @ A2B - B2REV (block-diagonal per molecule, entries exact in bf16)
    for _ in range(DEPTH - 1):
        agg = jnp.dot(m_ref[...], message,
                      preferred_element_type=f32)                 # fused gather/sum/-rev
        upd = jnp.dot(agg.astype(bf16), w_h_ref[...],
                      preferred_element_type=f32)
        message = jnp.maximum(inp.astype(f32) + upd, 0.0).astype(bf16)  # dropout p=0

    # atom readout: sum of incoming bond messages
    a_message = jnp.dot(a2b_ref[...], message,
                        preferred_element_type=f32)               # [TA, HID_PAD]
    # W_o(cat([f_atoms, a_message])) split into two matmuls (no in-kernel concat)
    atom_hiddens = (jnp.dot(f_atoms_ref[...], w_o_atom_ref[...],
                            preferred_element_type=f32)
                    + jnp.dot(a_message.astype(bf16), w_o_msg_ref[...],
                              preferred_element_type=f32)
                    + b_o_ref[...])
    atom_hiddens = jnp.maximum(atom_hiddens, 0.0).astype(bf16)    # dropout p=0

    # per-molecule mean pooling (a_scope): 0/1 selection matmul on the MXU,
    # then the 1/a_size scale as a VPU broadcast multiply (exact f32 scale).
    pooled = jnp.dot(molcnt_ref[...], atom_hiddens,
                     preferred_element_type=f32)                  # [TM, HID_PAD]
    out_ref[...] = pooled * inv_ref[...]


def mpn_encoder_pallas(f_atoms_t, f_bonds_t, M_t, A2B_t, MOLCNT_t, INV_t,
                       W_i_p, W_h_p, W_o_atom_p, W_o_msg_p, b_o_p):
    n_tiles = f_atoms_t.shape[0]
    grid_spec = pltpu.PrefetchScalarGridSpec(
        num_scalar_prefetch=0,
        grid=(n_tiles,),
        in_specs=[
            pl.BlockSpec((None, TILE_ATOMS, ATOM_FDIM), lambda t: (t, 0, 0)),
            pl.BlockSpec((None, TILE_BONDS, BOND_FDIM), lambda t: (t, 0, 0)),
            pl.BlockSpec((None, TILE_BONDS, TILE_BONDS), lambda t: (t, 0, 0)),
            pl.BlockSpec((None, TILE_ATOMS, TILE_BONDS), lambda t: (t, 0, 0)),
            pl.BlockSpec((None, TILE_MOLS, TILE_ATOMS), lambda t: (t, 0, 0)),
            pl.BlockSpec((None, TILE_MOLS, 1), lambda t: (t, 0, 0)),
            pl.BlockSpec((BOND_FDIM, HID_PAD), lambda t: (0, 0)),
            pl.BlockSpec((HID_PAD, HID_PAD), lambda t: (0, 0)),
            pl.BlockSpec((ATOM_FDIM, HID_PAD), lambda t: (0, 0)),
            pl.BlockSpec((HID_PAD, HID_PAD), lambda t: (0, 0)),
            pl.BlockSpec((1, HID_PAD), lambda t: (0, 0)),
        ],
        out_specs=pl.BlockSpec((None, TILE_MOLS, HID_PAD), lambda t: (t, 0, 0)),
    )
    return pl.pallas_call(
        mpn_kernel,
        out_shape=jax.ShapeDtypeStruct((n_tiles, TILE_MOLS, HID_PAD), jnp.float32),
        grid_spec=grid_spec,
        compiler_params=pltpu.CompilerParams(
            dimension_semantics=("parallel",),      # shard tiles across TCs (v7x)
            vmem_limit_bytes=32 * 1024 * 1024,      # safe under v7x 64 MiB physical
        ),
    )(f_atoms_t, f_bonds_t, M_t, A2B_t, MOLCNT_t, INV_t,
      W_i_p, W_h_p, W_o_atom_p, W_o_msg_p, b_o_p)


# ------------------------- synthetic graph construction ----------------------
def make_molecules(n_mols=56, seed=0):
    """Small synthetic molecules: chains of 4-9 atoms, ~half closed into rings."""
    rng = np.random.default_rng(seed)
    mols = []
    for _ in range(n_mols):
        n = int(rng.integers(4, 10))
        bonds = [(j, j + 1) for j in range(n - 1)]
        if rng.random() < 0.5:
            bonds.append((n - 1, 0))
        mols.append((n, bonds))
    return mols


def build_graph(mols):
    """Builds chemprop-style global index tables (for the gather reference) and
    the tile-packed dense operators used by the kernel (first-fit-decreasing
    packing, tile count padded to an even number for v7x megacore)."""
    # ---- global (chemprop-style) structures for the reference ----
    a_scope = []
    atoms = 1                      # padding atom 0
    bond_src = [0]                 # padding bond 0
    bond_dst = [0]
    b2revb = [0]
    mol_bond_start = []
    for n_atoms_m, ubonds in mols:
        a_start = atoms
        a_scope.append((a_start, n_atoms_m))
        mol_bond_start.append(len(bond_src))
        for (u, v) in ubonds:
            gu, gv = a_start + u, a_start + v
            b1 = len(bond_src)     # gu -> gv
            b2 = b1 + 1            # gv -> gu
            bond_src += [gu, gv]
            bond_dst += [gv, gu]
            b2revb += [b2, b1]
        atoms += n_atoms_m
    n_atoms_tot = atoms
    n_bonds_tot = len(bond_src)

    a2b_lists = [[] for _ in range(n_atoms_tot)]
    for b in range(1, n_bonds_tot):
        a2b_lists[bond_dst[b]].append(b)
    max_nb = max(1, max(len(l) for l in a2b_lists))
    a2b_idx = np.zeros((n_atoms_tot, max_nb), dtype=np.int32)
    for a, l in enumerate(a2b_lists):
        a2b_idx[a, :len(l)] = l
    b2a_idx = np.array(bond_src, dtype=np.int32)
    b2rev_idx = np.array(b2revb, dtype=np.int32)

    # ---- first-fit-decreasing packing of molecules into fixed-size tiles ----
    order = sorted(range(len(mols)), key=lambda m: -len(mols[m][1]))
    tiles = []            # each: {'mols': [...], 'n_atoms', 'n_bonds'}
    placement = {}        # mol -> (tile, slot, a_off, b_off)
    for m in order:
        n_atoms_m, ubonds = mols[m]
        n_bonds_m = 2 * len(ubonds)
        ti = None
        for j, t in enumerate(tiles):
            if (t['n_atoms'] + n_atoms_m <= TILE_ATOMS
                    and t['n_bonds'] + n_bonds_m <= TILE_BONDS
                    and len(t['mols']) < TILE_MOLS):
                ti = j
                break
        if ti is None:
            tiles.append({'mols': [], 'n_atoms': 0, 'n_bonds': 0})
            ti = len(tiles) - 1
        t = tiles[ti]
        placement[m] = (ti, len(t['mols']), t['n_atoms'], t['n_bonds'])
        t['mols'].append(m)
        t['n_atoms'] += n_atoms_m
        t['n_bonds'] += n_bonds_m

    if len(tiles) % 2 == 1:
        # keep the tile grid even so the 2 v7x TensorCores both get work
        tiles.append({'mols': [], 'n_atoms': 0, 'n_bonds': 0})
    n_tiles = len(tiles)

    A2B_t = np.zeros((n_tiles, TILE_ATOMS, TILE_BONDS), np.float32)
    M_t = np.zeros((n_tiles, TILE_BONDS, TILE_BONDS), np.float32)
    MOLCNT_t = np.zeros((n_tiles, TILE_MOLS, TILE_ATOMS), np.float32)   # 0/1 selection
    INV_t = np.zeros((n_tiles, TILE_MOLS, 1), np.float32)               # 1/a_size
    atom_rows = np.zeros((n_tiles, TILE_ATOMS), np.int32)   # global atom idx (0 = zero row)
    bond_rows = np.zeros((n_tiles, TILE_BONDS), np.int32)   # global bond idx (0 = zero row)
    mol_rows = np.zeros((len(mols),), np.int32)

    B2A_loc = np.zeros((n_tiles, TILE_BONDS, TILE_ATOMS), np.float32)
    B2REV_loc = np.zeros((n_tiles, TILE_BONDS, TILE_BONDS), np.float32)
    for m, (ti, slot, a_off, b_off) in placement.items():
        n_atoms_m, ubonds = mols[m]
        g_a_start, _ = a_scope[m]
        g_b_start = mol_bond_start[m]
        mol_rows[m] = ti * TILE_MOLS + slot
        INV_t[ti, slot, 0] = 1.0 / n_atoms_m
        for la in range(n_atoms_m):
            atom_rows[ti, a_off + la] = g_a_start + la
            MOLCNT_t[ti, slot, a_off + la] = 1.0
        for k, (u, v) in enumerate(ubonds):
            lb1 = b_off + 2 * k        # u -> v
            lb2 = lb1 + 1              # v -> u
            bond_rows[ti, lb1] = g_b_start + 2 * k
            bond_rows[ti, lb2] = g_b_start + 2 * k + 1
            A2B_t[ti, a_off + v, lb1] = 1.0
            A2B_t[ti, a_off + u, lb2] = 1.0
            B2A_loc[ti, lb1, a_off + u] = 1.0
            B2A_loc[ti, lb2, a_off + v] = 1.0
            B2REV_loc[ti, lb1, lb2] = 1.0
            B2REV_loc[ti, lb2, lb1] = 1.0
    for ti in range(n_tiles):
        # fused propagation operator; entries in {-1,0,1} -> lossless in bf16
        M_t[ti] = B2A_loc[ti] @ A2B_t[ti] - B2REV_loc[ti]

    # padding safety: padded mol slots / atom cols / bond rows must be exactly
    # zero so padded atoms (which get relu(b_o) != 0) never leak into outputs.
    for ti, t in enumerate(tiles):
        assert np.all(MOLCNT_t[ti, len(t['mols']):, :] == 0.0)
        assert np.all(MOLCNT_t[ti, :, t['n_atoms']:] == 0.0)
        assert np.all(INV_t[ti, len(t['mols']):, :] == 0.0)
        assert np.all(A2B_t[ti, :, t['n_bonds']:] == 0.0)
        assert np.all(M_t[ti, t['n_bonds']:, :] == 0.0)
        assert np.all(M_t[ti, :, t['n_bonds']:] == 0.0)

    return dict(
        n_atoms_tot=n_atoms_tot, n_bonds_tot=n_bonds_tot, a_scope=a_scope,
        a2b_idx=a2b_idx, b2a_idx=b2a_idx, b2rev_idx=b2rev_idx,
        A2B_t=A2B_t, M_t=M_t, MOLCNT_t=MOLCNT_t, INV_t=INV_t,
        atom_rows=atom_rows, bond_rows=bond_rows, mol_rows=mol_rows,
        n_tiles=n_tiles)


# ------------------------- pure-JAX gather reference --------------------------
def reference(f_atoms, f_bonds, a2b_idx, b2a_idx, b2rev_idx, a_scope,
              W_i, W_h, W_o_full, b_o):
    inp = f_bonds @ W_i
    message = jnp.maximum(inp, 0.0)
    for _ in range(DEPTH - 1):
        nei = message[a2b_idx]                 # [Na, max_nb, H]
        a_msg = nei.sum(axis=1)
        rev = message[b2rev_idx]
        message = a_msg[b2a_idx] - rev
        message = message @ W_h
        message = jnp.maximum(inp + message, 0.0)
    nei = message[a2b_idx]
    a_msg = nei.sum(axis=1)
    a_input = jnp.concatenate([f_atoms, a_msg], axis=1)
    atom_hiddens = jnp.maximum(a_input @ W_o_full + b_o, 0.0)
    mol_vecs = []
    for (a_start, a_size) in a_scope:
        mol_vecs.append(atom_hiddens[a_start:a_start + a_size].sum(axis=0) / a_size)
    return jnp.stack(mol_vecs, axis=0)


# ------------------------------------ main ------------------------------------
if __name__ == "__main__":
    mols = make_molecules(n_mols=56, seed=0)
    g = build_graph(mols)
    a_scope = g["a_scope"]
    n_mols = len(a_scope)

    key = jax.random.PRNGKey(0)
    k_fa, k_fb, k_wi, k_wh, k_wo, k_bo = jax.random.split(key, 6)

    # features (row 0 is the zero padding row, as in BatchMolGraph)
    f_atoms = jax.random.normal(k_fa, (g["n_atoms_tot"], ATOM_FDIM), jnp.float32)
    f_atoms = f_atoms.at[0].set(0.0)
    f_bonds = jax.random.normal(k_fb, (g["n_bonds_tot"], BOND_FDIM), jnp.float32)
    f_bonds = f_bonds.at[0].set(0.0)

    # deterministic synthetic parameters (stored as [in_dim, out_dim] for x @ W)
    W_i = jax.random.normal(k_wi, (BOND_FDIM, HIDDEN), jnp.float32) * 0.1
    W_h = jax.random.normal(k_wh, (HIDDEN, HIDDEN), jnp.float32) * 0.1
    W_o_full = jax.random.normal(k_wo, (ATOM_FDIM + HIDDEN, HIDDEN), jnp.float32) * 0.1
    b_o = jax.random.normal(k_bo, (1, HIDDEN), jnp.float32) * 0.1
    W_o_atom = W_o_full[:ATOM_FDIM]
    W_o_msg = W_o_full[ATOM_FDIM:]

    # --- pad weights to HID_PAD lanes; extra channels are zero and drop out ---
    W_i_p = jnp.zeros((BOND_FDIM, HID_PAD), jnp.float32).at[:, :HIDDEN].set(W_i)
    W_h_p = jnp.zeros((HID_PAD, HID_PAD), jnp.float32).at[:HIDDEN, :HIDDEN].set(W_h)
    W_o_atom_p = jnp.zeros((ATOM_FDIM, HID_PAD), jnp.float32).at[:, :HIDDEN].set(W_o_atom)
    W_o_msg_p = jnp.zeros((HID_PAD, HID_PAD), jnp.float32).at[:HIDDEN, :HIDDEN].set(W_o_msg)
    b_o_p = jnp.zeros((1, HID_PAD), jnp.float32).at[:, :HIDDEN].set(b_o)

    # --- scatter features into molecule tiles (global row 0 is zero padding) ---
    f_atoms_t = f_atoms[jnp.asarray(g["atom_rows"])]   # [n_tiles, TILE_ATOMS, ATOM_FDIM]
    f_bonds_t = f_bonds[jnp.asarray(g["bond_rows"])]   # [n_tiles, TILE_BONDS, BOND_FDIM]

    bf16 = jnp.bfloat16
    out_tiles = mpn_encoder_pallas(
        f_atoms_t.astype(bf16), f_bonds_t.astype(bf16),
        jnp.asarray(g["M_t"]).astype(bf16), jnp.asarray(g["A2B_t"]).astype(bf16),
        jnp.asarray(g["MOLCNT_t"]).astype(bf16), jnp.asarray(g["INV_t"]),
        W_i_p.astype(bf16), W_h_p.astype(bf16),
        W_o_atom_p.astype(bf16), W_o_msg_p.astype(bf16), b_o_p)
    out_tiles = jax.block_until_ready(out_tiles)

    # un-tile: pick the real molecule rows, drop padded hidden channels
    out = out_tiles.reshape(g["n_tiles"] * TILE_MOLS, HID_PAD)[jnp.asarray(g["mol_rows"])]
    out = out[:, :HIDDEN]

    ref = reference(f_atoms, f_bonds,
                    jnp.asarray(g["a2b_idx"]), jnp.asarray(g["b2a_idx"]),
                    jnp.asarray(g["b2rev_idx"]), a_scope,
                    W_i, W_h, W_o_full, b_o)
    ref = jax.block_until_ready(ref)

    assert out.shape == (n_mols, HIDDEN)
    # bf16 MXU operands / bf16 live message state (f32 accumulation) -> loose tol
    np.testing.assert_allclose(np.asarray(out), np.asarray(ref), rtol=3e-2, atol=3e-2)
    print("KERNEL_OK")
</pallas_src>

<mosaic_0001>
module attributes {stable_mosaic.version = 11 : i64} {
  func.func @mpn_kernel(%arg0: i32, %arg1: memref<1x256x16xbf16, #tpu.memory_space<vmem>>, %arg2: memref<1x256x24xbf16, #tpu.memory_space<vmem>>, %arg3: memref<1x256x256xbf16, #tpu.memory_space<vmem>>, %arg4: memref<1x256x256xbf16, #tpu.memory_space<vmem>>, %arg5: memref<1x64x256xbf16, #tpu.memory_space<vmem>>, %arg6: memref<1x64x1xf32, #tpu.memory_space<vmem>>, %arg7: memref<24x128xbf16, #tpu.memory_space<vmem>>, %arg8: memref<128x128xbf16, #tpu.memory_space<vmem>>, %arg9: memref<16x128xbf16, #tpu.memory_space<vmem>>, %arg10: memref<128x128xbf16, #tpu.memory_space<vmem>>, %arg11: memref<1x128xf32, #tpu.memory_space<vmem>>, %arg12: memref<1x64x128xf32, #tpu.memory_space<vmem>>) attributes {dimension_semantics = [#tpu.dimension_semantics<parallel>], iteration_bounds = array<i64: 4>, scalar_prefetch = 0 : i64, scratch_operands = 0 : i64, tpu.core_type = #tpu.core_type<tc>, window_params = [{transform_indices = @transform_0, window_bounds = array<i64: 1, 256, 16>}, {transform_indices = @transform_1, window_bounds = array<i64: 1, 256, 24>}, {transform_indices = @transform_2, window_bounds = array<i64: 1, 256, 256>}, {transform_indices = @transform_3, window_bounds = array<i64: 1, 256, 256>}, {transform_indices = @transform_4, window_bounds = array<i64: 1, 64, 256>}, {transform_indices = @transform_5, window_bounds = array<i64: 1, 64, 1>}, {pipeline_mode = #tpu.pipeline_mode<synchronous>, transform_indices = @transform_6, window_bounds = array<i64: 24, 128>}, {pipeline_mode = #tpu.pipeline_mode<synchronous>, transform_indices = @transform_7, window_bounds = array<i64: 128, 128>}, {pipeline_mode = #tpu.pipeline_mode<synchronous>, transform_indices = @transform_8, window_bounds = array<i64: 16, 128>}, {pipeline_mode = #tpu.pipeline_mode<synchronous>, transform_indices = @transform_9, window_bounds = array<i64: 128, 128>}, {pipeline_mode = #tpu.pipeline_mode<synchronous>, transform_indices = @transform_10, window_bounds = array<i64: 1, 128>}, {transform_indices = @transform_11, window_bounds = array<i64: 1, 64, 128>}]} {
    %c0 = arith.constant 0 : index
    %c0_0 = arith.constant 0 : index
    %c0_1 = arith.constant 0 : index
    %0 = vector.load %arg2[%c0, %c0_0, %c0_1] : memref<1x256x24xbf16, #tpu.memory_space<vmem>>, vector<1x256x24xbf16>
    %1 = vector.shape_cast %0 : vector<1x256x24xbf16> to vector<256x24xbf16>
    %c0_2 = arith.constant 0 : index
    %c0_3 = arith.constant 0 : index
    %2 = vector.load %arg7[%c0_2, %c0_3] : memref<24x128xbf16, #tpu.memory_space<vmem>>, vector<24x128xbf16>
    %cst = arith.constant dense<0.000000e+00> : vector<256x128xf32>
    %3 = tpu.matmul %1, %2, %cst {dimension_numbers = #tpu.dot_dimension_numbers<[1], [0], [0], [1], [0, 0, 1, 1], [], []>} : vector<256x24xbf16>, vector<24x128xbf16>, vector<256x128xf32> -> vector<256x128xf32>
    %4 = arith.truncf %3 : vector<256x128xf32> to vector<256x128xbf16>
    %cst_4 = arith.constant 0.000000e+00 : bf16
    %5 = vector.broadcast %cst_4 : bf16 to vector<256x128xbf16>
    %6 = arith.maximumf %4, %5 : vector<256x128xbf16>
    %c0_5 = arith.constant 0 : index
    %c0_6 = arith.constant 0 : index
    %c0_7 = arith.constant 0 : index
    %7 = vector.load %arg3[%c0_5, %c0_6, %c0_7] : memref<1x256x256xbf16, #tpu.memory_space<vmem>>, vector<1x256x256xbf16>
    %8 = vector.shape_cast %7 : vector<1x256x256xbf16> to vector<256x256xbf16>
    %cst_8 = arith.constant dense<0.000000e+00> : vector<256x128xf32>
    %9 = tpu.matmul %8, %6, %cst_8 {dimension_numbers = #tpu.dot_dimension_numbers<[1], [0], [0], [1], [0, 0, 1, 1], [], []>} : vector<256x256xbf16>, vector<256x128xbf16>, vector<256x128xf32> -> vector<256x128xf32>
    %10 = arith.truncf %9 : vector<256x128xf32> to vector<256x128xbf16>
    %c0_9 = arith.constant 0 : index
    %c0_10 = arith.constant 0 : index
    %11 = vector.load %arg8[%c0_9, %c0_10] : memref<128x128xbf16, #tpu.memory_space<vmem>>, vector<128x128xbf16>
    %cst_11 = arith.constant dense<0.000000e+00> : vector<256x128xf32>
    %12 = tpu.matmul %10, %11, %cst_11 {dimension_numbers = #tpu.dot_dimension_numbers<[1], [0], [0], [1], [0, 0, 1, 1], [], []>} : vector<256x128xbf16>, vector<128x128xbf16>, vector<256x128xf32> -> vector<256x128xf32>
    %13 = arith.extf %4 : vector<256x128xbf16> to vector<256x128xf32>
    %14 = arith.addf %13, %12 : vector<256x128xf32>
    %cst_12 = arith.constant 0.000000e+00 : f32
    %15 = vector.broadcast %cst_12 : f32 to vector<256x128xf32>
    %16 = arith.maximumf %14, %15 : vector<256x128xf32>
    %17 = arith.truncf %16 : vector<256x128xf32> to vector<256x128xbf16>
    %c0_13 = arith.constant 0 : index
    %c0_14 = arith.constant 0 : index
    %c0_15 = arith.constant 0 : index
    %18 = vector.load %arg3[%c0_13, %c0_14, %c0_15] : memref<1x256x256xbf16, #tpu.memory_space<vmem>>, vector<1x256x256xbf16>
    %19 = vector.shape_cast %18 : vector<1x256x256xbf16> to vector<256x256xbf16>
    %cst_16 = arith.constant dense<0.000000e+00> : vector<256x128xf32>
    %20 = tpu.matmul %19, %17, %cst_16 {dimension_numbers = #tpu.dot_dimension_numbers<[1], [0], [0], [1], [0, 0, 1, 1], [], []>} : vector<256x256xbf16>, vector<256x128xbf16>, vector<256x128xf32> -> vector<256x128xf32>
    %21 = arith.truncf %20 : vector<256x128xf32> to vector<256x128xbf16>
    %c0_17 = arith.constant 0 : index
    %c0_18 = arith.constant 0 : index
    %22 = vector.load %arg8[%c0_17, %c0_18] : memref<128x128xbf16, #tpu.memory_space<vmem>>, vector<128x128xbf16>
    %cst_19 = arith.constant dense<0.000000e+00> : vector<256x128xf32>
    %23 = tpu.matmul %21, %22, %cst_19 {dimension_numbers = #tpu.dot_dimension_numbers<[1], [0], [0], [1], [0, 0, 1, 1], [], []>} : vector<256x128xbf16>, vector<128x128xbf16>, vector<256x128xf32> -> vector<256x128xf32>
    %24 = arith.extf %4 : vector<256x128xbf16> to vector<256x128xf32>
    %25 = arith.addf %24, %23 : vector<256x128xf32>
    %cst_20 = arith.constant 0.000000e+00 : f32
    %26 = vector.broadcast %cst_20 : f32 to vector<256x128xf32>
    %27 = arith.maximumf %25, %26 : vector<256x128xf32>
    %28 = arith.truncf %27 : vector<256x128xf32> to vector<256x128xbf16>
    %c0_21 = arith.constant 0 : index
    %c0_22 = arith.constant 0 : index
    %c0_23 = arith.constant 0 : index
    %29 = vector.load %arg4[%c0_21, %c0_22, %c0_23] : memref<1x256x256xbf16, #tpu.memory_space<vmem>>, vector<1x256x256xbf16>
    %30 = vector.shape_cast %29 : vector<1x256x256xbf16> to vector<256x256xbf16>
    %cst_24 = arith.constant dense<0.000000e+00> : vector<256x128xf32>
    %31 = tpu.matmul %30, %28, %cst_24 {dimension_numbers = #tpu.dot_dimension_numbers<[1], [0], [0], [1], [0, 0, 1, 1], [], []>} : vector<256x256xbf16>, vector<256x128xbf16>, vector<256x128xf32> -> vector<256x128xf32>
    %c0_25 = arith.constant 0 : index
    %c0_26 = arith.constant 0 : index
    %c0_27 = arith.constant 0 : index
    %32 = vector.load %arg1[%c0_25, %c0_26, %c0_27] : memref<1x256x16xbf16, #tpu.memory_space<vmem>>, vector<1x256x16xbf16>
    %33 = vector.shape_cast %32 : vector<1x256x16xbf16> to vector<256x16xbf16>
    %c0_28 = arith.constant 0 : index
    %c0_29 = arith.constant 0 : index
    %34 = vector.load %arg9[%c0_28, %c0_29] : memref<16x128xbf16, #tpu.memory_space<vmem>>, vector<16x128xbf16>
    %cst_30 = arith.constant dense<0.000000e+00> : vector<256x128xf32>
    %35 = tpu.matmul %33, %34, %cst_30 {dimension_numbers = #tpu.dot_dimension_numbers<[1], [0], [0], [1], [0, 0, 1, 1], [], []>} : vector<256x16xbf16>, vector<16x128xbf16>, vector<256x128xf32> -> vector<256x128xf32>
    %36 = arith.truncf %31 : vector<256x128xf32> to vector<256x128xbf16>
    %c0_31 = arith.constant 0 : index
    %c0_32 = arith.constant 0 : index
    %37 = vector.load %arg10[%c0_31, %c0_32] : memref<128x128xbf16, #tpu.memory_space<vmem>>, vector<128x128xbf16>
    %cst_33 = arith.constant dense<0.000000e+00> : vector<256x128xf32>
    %38 = tpu.matmul %36, %37, %cst_33 {dimension_numbers = #tpu.dot_dimension_numbers<[1], [0], [0], [1], [0, 0, 1, 1], [], []>} : vector<256x128xbf16>, vector<128x128xbf16>, vector<256x128xf32> -> vector<256x128xf32>
    %39 = arith.addf %35, %38 : vector<256x128xf32>
    %c0_34 = arith.constant 0 : index
    %c0_35 = arith.constant 0 : index
    %40 = vector.load %arg11[%c0_34, %c0_35] : memref<1x128xf32, #tpu.memory_space<vmem>>, vector<1x128xf32>
    %41 = vector.broadcast %40 : vector<1x128xf32> to vector<256x128xf32>
    %42 = arith.addf %39, %41 : vector<256x128xf32>
    %cst_36 = arith.constant 0.000000e+00 : f32
    %43 = vector.broadcast %cst_36 : f32 to vector<256x128xf32>
    %44 = arith.maximumf %42, %43 : vector<256x128xf32>
    %45 = arith.truncf %44 : vector<256x128xf32> to vector<256x128xbf16>
    %c0_37 = arith.constant 0 : index
    %c0_38 = arith.constant 0 : index
    %c0_39 = arith.constant 0 : index
    %46 = vector.load %arg5[%c0_37, %c0_38, %c0_39] : memref<1x64x256xbf16, #tpu.memory_space<vmem>>, vector<1x64x256xbf16>
    %47 = vector.shape_cast %46 : vector<1x64x256xbf16> to vector<64x256xbf16>
    %cst_40 = arith.constant dense<0.000000e+00> : vector<64x128xf32>
    %48 = tpu.matmul %47, %45, %cst_40 {dimension_numbers = #tpu.dot_dimension_numbers<[1], [0], [0], [1], [0, 0, 1, 1], [], []>} : vector<64x256xbf16>, vector<256x128xbf16>, vector<64x128xf32> -> vector<64x128xf32>
    %c0_41 = arith.constant 0 : index
    %c0_42 = arith.constant 0 : index
    %c0_43 = arith.constant 0 : index
    %49 = vector.load %arg6[%c0_41, %c0_42, %c0_43] : memref<1x64x1xf32, #tpu.memory_space<vmem>>, vector<1x64x1xf32>
    %50 = vector.shape_cast %49 : vector<1x64x1xf32> to vector<64x1xf32>
    %51 = vector.broadcast %50 : vector<64x1xf32> to vector<64x128xf32>
    %52 = arith.mulf %48, %51 : vector<64x128xf32>
    %c0_44 = arith.constant 0 : index
    %c0_45 = arith.constant 0 : index
    %c0_46 = arith.constant 0 : index
    %53 = vector.load %arg12[%c0_44, %c0_45, %c0_46] : memref<1x64x128xf32, #tpu.memory_space<vmem>>, vector<1x64x128xf32>
    %54 = vector.shape_cast %53 : vector<1x64x128xf32> to vector<64x128xf32>
    %55 = vector.shape_cast %52 : vector<64x128xf32> to vector<1x64x128xf32>
    tpu.vector_store %arg12[%c0_44, %c0_45, %c0_46], %55 {strides = array<i32>} : memref<1x64x128xf32, #tpu.memory_space<vmem>>, vector<1x64x128xf32>,
    return
  }
  func.func @transform_0(%arg0: i32) -> (i32, i32, i32) {
    %c0_i32 = arith.constant 0 : i32
    %c0_i32_0 = arith.constant 0 : i32
    %c0_i32_1 = arith.constant 0 : i32
    return %arg0, %c0_i32, %c0_i32_0 : i32, i32, i32
  }
  func.func @transform_1(%arg0: i32) -> (i32, i32, i32) {
    %c0_i32 = arith.constant 0 : i32
    %c0_i32_0 = arith.constant 0 : i32
    %c0_i32_1 = arith.constant 0 : i32
    return %arg0, %c0_i32, %c0_i32_0 : i32, i32, i32
  }
  func.func @transform_2(%arg0: i32) -> (i32, i32, i32) {
    %c0_i32 = arith.constant 0 : i32
    %c0_i32_0 = arith.constant 0 : i32
    %c0_i32_1 = arith.constant 0 : i32
    return %arg0, %c0_i32, %c0_i32_0 : i32, i32, i32
  }
  func.func @transform_3(%arg0: i32) -> (i32, i32, i32) {
    %c0_i32 = arith.constant 0 : i32
    %c0_i32_0 = arith.constant 0 : i32
    %c0_i32_1 = arith.constant 0 : i32
    return %arg0, %c0_i32, %c0_i32_0 : i32, i32, i32
  }
  func.func @transform_4(%arg0: i32) -> (i32, i32, i32) {
    %c0_i32 = arith.constant 0 : i32
    %c0_i32_0 = arith.constant 0 : i32
    %c0_i32_1 = arith.constant 0 : i32
    return %arg0, %c0_i32, %c0_i32_0 : i32, i32, i32
  }
  func.func @transform_5(%arg0: i32) -> (i32, i32, i32) {
    %c0_i32 = arith.constant 0 : i32
    %c0_i32_0 = arith.constant 0 : i32
    %c0_i32_1 = arith.constant 0 : i32
    return %arg0, %c0_i32, %c0_i32_0 : i32, i32, i32
  }
  func.func @transform_6(%arg0: i32) -> (i32, i32) {
    %c0_i32 = arith.constant 0 : i32
    %c0_i32_0 = arith.constant 0 : i32
    %c0_i32_1 = arith.constant 0 : i32
    return %c0_i32, %c0_i32_0 : i32, i32
  }
  func.func @transform_7(%arg0: i32) -> (i32, i32) {
    %c0_i32 = arith.constant 0 : i32
    %c0_i32_0 = arith.constant 0 : i32
    %c0_i32_1 = arith.constant 0 : i32
    return %c0_i32, %c0_i32_0 : i32, i32
  }
  func.func @transform_8(%arg0: i32) -> (i32, i32) {
    %c0_i32 = arith.constant 0 : i32
    %c0_i32_0 = arith.constant 0 : i32
    %c0_i32_1 = arith.constant 0 : i32
    return %c0_i32, %c0_i32_0 : i32, i32
  }
  func.func @transform_9(%arg0: i32) -> (i32, i32) {
    %c0_i32 = arith.constant 0 : i32
    %c0_i32_0 = arith.constant 0 : i32
    %c0_i32_1 = arith.constant 0 : i32
    return %c0_i32, %c0_i32_0 : i32, i32
  }
  func.func @transform_10(%arg0: i32) -> (i32, i32) {
    %c0_i32 = arith.constant 0 : i32
    %c0_i32_0 = arith.constant 0 : i32
    %c0_i32_1 = arith.constant 0 : i32
    return %c0_i32, %c0_i32_0 : i32, i32
  }
  func.func @transform_11(%arg0: i32) -> (i32, i32, i32) {
    %c0_i32 = arith.constant 0 : i32
    %c0_i32_0 = arith.constant 0 : i32
    %c0_i32_1 = arith.constant 0 : i32
    return %arg0, %c0_i32, %c0_i32_0 : i32, i32, i32
  }
}

</mosaic_0001>

<bundles_post_ra>
// kernel: tpu_custom_call.1
= control target key start
LH: loop header
LB: loop body
LE: loop exit
PB: predicated region body
PF: predicated region fallthrough
CT: control target
= control target key end

     0   :  { %16 = vsyncpa [#allocation3], 0  ;;  %s5566_s0 = inlined_call_operand.vmem [shape: bf16[4,256,16], index: 0, kind: input, shape index: {}]   ;;  %s5567_s1 = inlined_call_operand.vmem [shape: bf16[4,256,24], index: 1, kind: input, shape index: {}]   ;;  %s5568_s2 = inlined_call_operand.vmem [shape: bf16[4,256,256], index: 2, kind: input, shape index: {}]   ;;  %s5569_s3 = inlined_call_operand.hbm [shape: bf16[4,256,256], index: 3, kind: input, shape index: {}]   ;;  %s5570_s4 = inlined_call_operand.vmem [shape: bf16[4,64,256], index: 4, kind: input, shape index: {}]   ;;  %s5571_s5 = inlined_call_operand.vmem [shape: f32[4,64,1], index: 5, kind: input, shape index: {}]   ;;  %s5572_s6 = inlined_call_operand.vmem [shape: bf16[24,128], index: 6, kind: input, shape index: {}]   ;;  %s5573_s7 = inlined_call_operand.vmem [shape: bf16[128,128], index: 7, kind: input, shape index: {}]   ;;  %s5574_s8 = inlined_call_operand.vmem [shape: bf16[16,128], index: 8, kind: input, shape index: {}]   ;;  %s5575_s9 = inlined_call_operand.vmem [shape: bf16[128,128], index: 9, kind: input, shape index: {}]   ;;  %s5576_s10 = inlined_call_operand.vmem [shape: f32[1,128], index: 10, kind: input, shape index: {}]   ;;  %s5577_s11 = inlined_call_operand.hbm [shape: f32[4,64,128], index: 11, kind: output, shape index: {}]  }
   0x1   :  { %18 = vsyncpa [#allocation3 + $0x1], 0 }
   0x2   :  { %19 = vsyncpa [#allocation4], 0 }
   0x3   :  { %21 = vsyncpa [#allocation4 + $0x1], 0  ;;  %s4593_s17 = smov 0   ;;  %s4595_s18 = smov 0  }
   0x4   :  { %s4597_s19 = smov 0   ;;  %s4599_s20 = smov 0  }
   0x5 LB: > { %5634 = sst [smem:[#allocation8_spill]] %s4520_s19  ;;  %s4614_s21 = sadd.s32 4294967295, %s4524_s20   ;;  %s4524_s20 = sphi %s4599_s20, %s5722_s20   ;;  %s4520_s19 = sphi %s4597_s19, %s5724_s19   ;;  %s4516_s18 = sphi %s4595_s18, %s5726_s18   ;;  %s4512_s17 = sphi %s4593_s17, %s5725_s17  }
   0x6   : > { %s3335_s22 = sadd.s32 4294967294, %s4524_s20   ;;  %s4618_s23 = sadd.s32 1, %s4524_s20  }
   0x7   : > { %5635 = sst [smem:[#allocation9_spill]] %s4618_s23  ;;  %s112_s24 = sadd.s32 1, %s4520_s19 }
   0x8   : > { %s109_s25 = ssub.s32 %s4524_s20, %s4618_s23  ;;  %p119_p0 = scmp.ne.s32.totalorder %s4520_s19, %s4516_s18 }
   0x9   : > { %p110_p1 = scmp.eq.s32.totalorder %s109_s25, 0  ;;  %p120_p2 = scmp.eq.s32.totalorder %s4524_s20, 0 }
   0xa   : > { %p125_p3 = scmp.ne.s32.totalorder %s4516_s18, %s4512_s17  ;;  %p126_p4 = scmp.eq.s32.totalorder %s4614_s21, 0 }
   0xb   : > { %s4630_s26 = scalar_select %p110_p1, %s4520_s19, %s112_s24  }
   0xc   : > { %p4632_p5 = por %p120_p2, %p119_p0  ;;  %p4636_p6 = por %p126_p4, %p125_p3 }
   0xd   : > { %5636 = sst [smem:[#allocation10_spill]] %s4630_s26  ;;  %p306_p7 = scmp.eq.s32.totalorder %s4614_s21, 3 }
   0xe   : > { %s5638_s28 = scalar_select %p4636_p6, 1, 0 }
   0xf   : > { %p312_p8 = scmp.eq.s32.totalorder %s3335_s22, 3  ;;  %p4232_p9 = scmp.lt.s32.totalorder %s4524_s20, 4 }
  0x10   : > { %p4642_p10 = por %p306_p7, %p119_p0  ;;  %s371_s12 = sand.u32 1, %s4520_s19  }
  0x11   : > { %p4646_p11 = por %p312_p8, %p125_p3  ;;  %s3515_s13 = sshll.u32 %s4524_s20, 12 }
  0x12   : > { %s5639_s29 = scalar_select %p4642_p10, 1, 0 }
  0x13   : > { %s5640_s30 = scalar_select %p4646_p11, 1, 0 }
  0x14   : > { %s3338_s14 = sshll.u32 %s371_s12, 8  ;;  %s4655_s24 = scalar_lea.hbm %s5569_s3, %s3515_s13 }
  0x15   : > { %5641 = sst [smem:[#allocation11_spill]] %s5640_s30  ;;  %s375_s22 = scalar_lea.vmem [#allocation2], %s3338_s14 }
  0x16   : > { %s382_s25 = sshll.u32 %s375_s22, 4  ;;  %p4659_p12 = pnand %p4232_p9, %p4632_p5  ;;  %s4663_s25 = int_to_ptr.vmem [resolvable:$true] %s382_s25 }
  0x17   : > { %s4665_s19 = scalar_lea.sflag [#allocation3], %s371_s12  ;;  %s4432_s23 = scalar_lea.hbm %s4655_s24, 4096 }
  0x18   : > { %p4433_p13 = scmp.ne.s32.totalorder %s4655_s24, %s4432_s23  ;;  %p4434_p0 = pneg %p4659_p12 }
  0x19   : > { %s4437_s14 = scalar_lea.hbm %s5569_s3, 16384  ;;  %p4438_p3 = scmp.lt.s32.totalorder %s4655_s24, %s5569_s3 }
  0x1a   : > { %p4435_p1 = pnand %p4434_p0, %p4433_p13  ;;  %p4439_p4 = scmp.lt.s32.totalorder %s4437_s14, %s4432_s23 }
  0x1c   : > { %p4436_p2 = pneg %p4435_p1  ;;  %p4440_p5 = por %p4439_p4, %p4438_p3 }
  0x1e   : > { %p4441_p7 = pnand %p4440_p5, %p4436_p2 }
  0x20   : > { %4444 = shalt.err (!%p4441_p7)
}
  0x21   : > { %s4445_s12 = scalar_lea.vmem %s4663_s25, 4096  ;;  %s4526_s22 = smov [#allocation2]  }
  0x22   : > { %p4446_p8 = scmp.ne.s32.totalorder %s4663_s25, %s4445_s12  ;;  %s4450_s30 = sshll.u32 %s4526_s22, 4  ;;  %s4451_s30 = int_to_ptr.vmem [resolvable:$false] %s4450_s30 }
  0x23   : > { %s4452_s13 = scalar_lea.vmem %s4451_s30, 8192  ;;  %p4453_p1 = scmp.lt.s32.totalorder %s4663_s25, %s4451_s30 }
  0x24   : > { %p4448_p9 = pnand %p4446_p8, %p4434_p0  ;;  %p4454_p11 = scmp.lt.s32.totalorder %s4452_s13, %s4445_s12 }
  0x26   : > { %p4449_p13 = pneg %p4448_p9  ;;  %p4455_p10 = por %p4454_p11, %p4453_p1 }
  0x28   : > { %p4456_p6 = pnand %p4455_p10, %p4449_p13 }
  0x2a   : > { %4459 = shalt.err (!%p4456_p6)
}
  0x2b   : > { %s4527_s23 = smov 128   ;;  %s4528_s15 = smov 8  }
  0x2c   : > { %4227 = dma.hbm_to_vmem [thread:$0]  (!%p4659_p12), %s4655_s24, 4096, %s4663_s25, %s4665_s19, %s4527_s23, %s4527_s23, %s4528_s15  }
  0x2d   : > { %p3341_p0 = scmp.ge.s32.totalorder %s4524_s20, 1  ;;  %p406_p2 = scmp.lt.s32.totalorder %s4524_s20, 5 }
  0x2f   : > { %p407_p3 = pnand %p3341_p0, %p406_p2 }
  0x31   : > { %410 = sbr.rel (%p407_p3) target bundleno = 2337 (0x921), region = 64 }
  0x36   : > { %s4689_s30 = sand.u32 1, %s4516_s18   ;;  %p5643_p6 = scmp.ne.s32.totalorder %s5638_s28, 0 }
  0x37   : > { %s3342_s14 = sshll.u32 %s4689_s30, 8  ;;  %s413_s27 = scalar_lea.sflag [#allocation3], %s4689_s30 }
  0x38   : > { %s4693_s16 = scalar_lea.vmem [#allocation2], %s3342_s14 }
  0x39   : > { %4503 = dma.done.wait (%p5643_p6), %s413_s27, 4096  }
  0x3a   : > { %4505 = vsyncadd (%p5643_p6), %s413_s27, 4294963200  ;;  %p480_p10 = scmp.lt.s32.totalorder %s4614_s21, 3  ;;  %vm679_vm0 = vcmask 1043456   ;;  %v4273_v0 = vld [vmem:[%s5572_s6 + $0x8] ss:$0 sps:$4 sm:$0xff]   ;;  %v4274_v1 = vld [vmem:[%s5572_s6] sm:$0xff]  }
  0x3b   : > { %vm630_vm1 = vcmask 195584   ;;  %4219 = vmatprep.subr.msk.bf16.mxu0 %vm679_vm0, %v4273_v0  ;;  %v681_v2 = vsel %vm679_vm0, %v4273_v0, 0  ;;  %v4529_v19 = vmov 0   ;;  %vm2714_vm2 = vcmask 130048   ;;  %s3343_s13 = sshll.u32 %s4689_s30, 6  ;;  %s3521_s15 = sshll.u32 %s4614_s21, 10 }
  0x3c   : > { %s4701_s19 = scalar_select %p480_p10, %s4614_s21, 3  ;;  %4006 = vmatpush3.bf16.msra.mxu0 %v681_v2  ;;  %4271 = vset.pattern.permute.xlu0 %v4529_v19 }
  0x3d   : > { %4007 = vmatprep.subr.bf16.mxu0 %v4274_v1  ;;  %4272 = vset.pattern.permute.xlu1 %v4529_v19  ;;  %s5507_s28 = scalar_lea.vmem [#allocation5], %s3343_s13  ;;  %s5523_s14 = scalar_lea.hbm %s5577_s11, %s3521_s15 }
  0x3e   : > { %s3516_s26 = sshll.u32 %s4701_s19, 7  ;;  %s3202_s23 = sshll.u32 %s5507_s28, 4  ;;  %s5517_s23 = int_to_ptr.vmem [resolvable:$true] %s3202_s23 }
  0x3f   : > { %s4709_s12 = scalar_lea.vmem %s5567_s1, %s3516_s26  ;;  %s4742_s27 = scalar_lea.vmem %s5566_s0, %s3516_s26 }
  0x40   : > { %v4275_v3 = vld [vmem:[%s4709_s12] sm:$0xff]   ;;  %v4276_v4 = vld [vmem:[%s4709_s12 + $0x8] sm:$0xff]   ;;  %4008 = vmatpush3.bf16.msra.mxu0 %v4274_v1  ;;  %v4277_v5 = vld [vmem:[%s4709_s12 + $0x10] sm:$0xff]   ;;  %s3518_s26 = sshll.u32 %s4701_s19, 8  ;;  %p5719_p12 = scmp.ne.s32.totalorder %s5639_s29, 0 }
  0x41   : > { %4009 = vmatprep.mubr.msk.bf16.mxu0 %vm630_vm1, %v4275_v3  ;;  %v4278_v6 = vld [vmem:[%s4709_s12 + $0x18] sm:$0xff]   ;;  %v4279_v7 = vld [vmem:[%s4709_s12 + $0x20] sm:$0xff]   ;;  %v4280_v8 = vld [vmem:[%s4709_s12 + $0x28] sm:$0xff]   ;;  %s4762_s22 = scalar_lea.vmem %s5568_s2, %s3518_s26  ;;  %s4530_s21 = smov [#allocation5]  }
  0x42   : > { %v4281_v9 = vld [vmem:[%s4709_s12 + $0x30] sm:$0xff]   ;;  %v4282_v10 = vld [vmem:[%s4709_s12 + $0x38] sm:$0xff]   ;;  %v4283_v11 = vld [vmem:[%s4709_s12 + $0x40] sm:$0xff]  }
  0x43   : > { %4010 = vmatmul.mubr.msk.bf16.vlgmr.msra.gmra.mxu0 %vm630_vm1, %v4276_v4  ;;  %v4284_v12 = vld [vmem:[%s4709_s12 + $0x48] sm:$0xff]   ;;  %v4285_v13 = vld [vmem:[%s4709_s12 + $0x50] sm:$0xff]   ;;  %v4286_v14 = vld [vmem:[%s4709_s12 + $0x58] sm:$0xff]  }
  0x44   : > { %4013 = vmatprep.mubr.msk.bf16.mxu0 %vm630_vm1, %v4277_v5  ;;  %v4287_v15 = vld [vmem:[%s4709_s12 + $0x60] sm:$0xff]   ;;  %v4288_v16 = vld [vmem:[%s4709_s12 + $0x68] sm:$0xff]   ;;  %v4289_v17 = vld [vmem:[%s4709_s12 + $0x70] sm:$0xff]  }
  0x45   : > { %v4290_v18 = vld [vmem:[%s4709_s12 + $0x78] sm:$0xff]   ;;  %v4765_v20 = vld [vmem:[%s4762_s22 + $0x4] ss:$8 sps:$4 sm:$0xff]  }
  0x46   : > { %1100 = vmatprep.mubr.bf16.mxu1 %v4765_v20 }
  0x4b   : > { %4014 = vmatmul.mubr.msk.bf16.gmra.mxu0 %vm630_vm1, %v4278_v6 }
  0x4c   : > { %4017 = vmatprep.mubr.msk.bf16.mxu0 %vm630_vm1, %v4279_v7 }
  0x53   : > { %4018 = vmatmul.mubr.msk.bf16.gmra.mxu0 %vm630_vm1, %v4280_v8 }
  0x54   : > { %4021 = vmatprep.mubr.msk.bf16.mxu0 %vm630_vm1, %v4281_v9 }
  0x5b   : > { %4022 = vmatmul.mubr.msk.bf16.gmra.mxu0 %vm630_vm1, %v4282_v10 }
  0x5c   : > { %4025 = vmatprep.mubr.msk.bf16.mxu0 %vm630_vm1, %v4283_v11 }
  0x63   : > { %4026 = vmatmul.mubr.msk.bf16.gmra.mxu0 %vm630_vm1, %v4284_v12 }
  0x64   : > { %4029 = vmatprep.mubr.msk.bf16.mxu0 %vm630_vm1, %v4285_v13 }
  0x6b   : > { %4030 = vmatmul.mubr.msk.bf16.gmra.mxu0 %vm630_vm1, %v4286_v14 }
  0x6c   : > { %4033 = vmatprep.mubr.msk.bf16.mxu0 %vm630_vm1, %v4287_v15 }
  0x73   : > { %4034 = vmatmul.mubr.msk.bf16.gmra.mxu0 %vm630_vm1, %v4288_v16 }
  0x74   : > { %4037 = vmatprep.mubr.msk.bf16.mxu0 %vm630_vm1, %v4289_v17 }
  0x7b   : > { %4038 = vmatmul.mubr.msk.bf16.gmra.mxu0 %vm630_vm1, %v4290_v18 }
 0x103   : > { %v4011_v21 = vpop.f32.mrf.mxu0 }
 0x105   : > { %v4768_v22 = vpop.f32.mrf.mxu0 }
 0x107   : > { %v4012_v23 = vpop.f32.mrf.mxu0 }
 0x108   : > { %v4770_v24 = vpack.c.bf16 %v4012_v23, %v4011_v21  ;;  %v4339_v23 = vld [vmem:[%s5573_s7 + $0x38] sm:$0xff]  }
 0x109   : > { %v4772_v25 = vpop.f32.mrf.mxu0  ;;  %4041 = vmatprep.subr.bf16.mxu0 %v4339_v23 }
 0x10a   : > { %5644 = vst [vmem:[#allocation12_spill] sm:$0xff] %v4770_v24  ;;  %v4830_v17 = vpack.c.bf16 %v4772_v25, %v4768_v22  ;;  %v861_v18 = vmax.bf16 %v4529_v19, %v4770_v24  ;;  %4042 = vmatpush3.bf16.msra.mxu0 %v4339_v23  ;;  %v4845_v25 = vld [vmem:[%s4762_s22] ss:$8 sps:$4 sm:$0xff]  }
 0x10b   : > { %v4015_v26 = vpop.f32.mrf.mxu0 }
 0x10c   : > { %v860_v22 = vmax.bf16 %v4529_v19, %v4830_v17 }
 0x10d   : > { %v733_v27 = vpop.f32.mrf.mxu0 }
 0x10f   : > { %v4016_v28 = vpop.f32.mrf.mxu0 }
 0x110   : > { %v4774_v29 = vpack.c.bf16 %v4016_v28, %v4015_v26  ;;  %v4340_v26 = vld [vmem:[%s5573_s7 + $0x30] sm:$0xff]  }
 0x111   : > { %v736_v30 = vpop.f32.mrf.mxu0  ;;  %4043 = vmatprep.subr.bf16.mxu0 %v4340_v26  ;;  %v4851_v28 = vld [vmem:[%s4762_s22 + $0x14] ss:$8 sps:$4 sm:$0xff]  }
 0x112   : > { %5645 = vst [vmem:[#allocation13_spill] sm:$0xff] %v4774_v29  ;;  %v4814_v10 = vpack.c.bf16 %v736_v30, %v733_v27  ;;  %v863_v11 = vmax.bf16 %v4529_v19, %v4774_v29  ;;  %v4341_v27 = vld [vmem:[%s5573_s7 + $0x28] sm:$0xff]   ;;  %4044 = vmatpush3.bf16.msra.mxu0 %v4340_v26  ;;  %v4859_v30 = vld [vmem:[%s4762_s22 + $0x10] ss:$8 sps:$4 sm:$0xff]  }
 0x113   : > { %v4019_v31 = vpop.f32.mrf.mxu0  ;;  %4045 = vmatprep.subr.bf16.mxu0 %v4341_v27 }
 0x114   : > { %v862_v14 = vmax.bf16 %v4529_v19, %v4814_v10 }
 0x115   : > { %v749_v32 = vpop.f32.mrf.mxu0 }
 0x116   : > { %4046 = vmatpush3.bf16.msra.mxu0 %v4341_v27 }
 0x117   : > { %v4020_v33 = vpop.f32.mrf.mxu0 }
 0x118   : > { %v4792_v63 = vpack.c.bf16 %v4020_v33, %v4019_v31  ;;  %v4862_v31 = vld [vmem:[%s4762_s22 + $0x24] ss:$8 sps:$4 sm:$0xff]   ;;  %v4870_v33 = vld [vmem:[%s4762_s22 + $0x34] ss:$8 sps:$4 sm:$0xff]  }
 0x119   : > { %v752_v34 = vpop.f32.mrf.mxu0 }
 0x11a   : > { %v4800_v3 = vpack.c.bf16 %v752_v34, %v749_v32  ;;  %v865_v4 = vmax.bf16 %v4529_v19, %v4792_v63  ;;  %v4867_v32 = vld [vmem:[%s4762_s22 + $0x20] ss:$8 sps:$4 sm:$0xff]   ;;  %v4875_v34 = vld [vmem:[%s4762_s22 + $0x30] ss:$8 sps:$4 sm:$0xff]  }
 0x11b   : > { %v4023_v35 = vpop.f32.mrf.mxu0  ;;  %5648 = vst [vmem:[#allocation16_spill] sm:$0xff] %v4875_v34 }
 0x11c   : > { %v864_v7 = vmax.bf16 %v4529_v19, %v4800_v3 }
 0x11d   : > { %v765_v36 = vpop.f32.mrf.mxu0 }
 0x11f   : > { %v4024_v37 = vpop.f32.mrf.mxu0 }
 0x120   : > { %v4776_v53 = vpack.c.bf16 %v4024_v37, %v4023_v35  ;;  %v4878_v35 = vld [vmem:[%s4762_s22 + $0x44] ss:$8 sps:$4 sm:$0xff]   ;;  %v4886_v37 = vld [vmem:[%s4762_s22 + $0x54] ss:$8 sps:$4 sm:$0xff]  }
 0x121   : > { %v768_v38 = vpop.f32.mrf.mxu0  ;;  %5649 = vst [vmem:[#allocation17_spill] sm:$0xff] %v4878_v35  ;;  %5651 = vst [vmem:[#allocation19_spill] sm:$0xff] %v4886_v37 }
 0x122   : > { %5646 = vst [vmem:[#allocation14_spill] sm:$0xff] %v4776_v53  ;;  %v4784_v59 = vpack.c.bf16 %v768_v38, %v765_v36  ;;  %v867_v60 = vmax.bf16 %v4529_v19, %v4776_v53  ;;  %v4883_v36 = vld [vmem:[%s4762_s22 + $0x40] ss:$8 sps:$4 sm:$0xff]   ;;  %v4891_v38 = vld [vmem:[%s4762_s22 + $0x50] ss:$8 sps:$4 sm:$0xff]  }
 0x123   : > { %v4027_v39 = vpop.f32.mrf.mxu0  ;;  %5650 = vst [vmem:[#allocation18_spill] sm:$0xff] %v4883_v36  ;;  %5652 = vst [vmem:[#allocation20_spill] sm:$0xff] %v4891_v38 }
 0x124   : > { %v866_v0 = vmax.bf16 %v4529_v19, %v4784_v59 }
 0x125   : > { %v781_v40 = vpop.f32.mrf.mxu0 }
 0x127   : > { %v4028_v41 = vpop.f32.mrf.mxu0 }
 0x128   : > { %v4818_v12 = vpack.c.bf16 %v4028_v41, %v4027_v39  ;;  %v4894_v39 = vld [vmem:[%s4762_s22 + $0x64] ss:$8 sps:$4 sm:$0xff]   ;;  %v4902_v41 = vld [vmem:[%s4762_s22 + $0x74] ss:$8 sps:$4 sm:$0xff]  }
 0x129   : > { %v784_v42 = vpop.f32.mrf.mxu0  ;;  %5653 = vst [vmem:[#allocation21_spill] sm:$0xff] %v4894_v39  ;;  %5655 = vst [vmem:[#allocation23_spill] sm:$0xff] %v4902_v41 }
 0x12a   : > { %v4824_v15 = vpack.c.bf16 %v784_v42, %v781_v40  ;;  %v869_v16 = vmax.bf16 %v4529_v19, %v4818_v12  ;;  %v4899_v40 = vld [vmem:[%s4762_s22 + $0x60] ss:$8 sps:$4 sm:$0xff]   ;;  %v4907_v42 = vld [vmem:[%s4762_s22 + $0x70] ss:$8 sps:$4 sm:$0xff]  }
 0x12b   : > { %v4031_v43 = vpop.f32.mrf.mxu0  ;;  %5654 = vst [vmem:[#allocation22_spill] sm:$0xff] %v4899_v40  ;;  %5656 = vst [vmem:[#allocation24_spill] sm:$0xff] %v4907_v42 }
 0x12c   : > { %v868_v21 = vmax.bf16 %v4529_v19, %v4824_v15 }
 0x12d   : > { %v797_v44 = vpop.f32.mrf.mxu0 }
 0x12f   : > { %v4032_v45 = vpop.f32.mrf.mxu0 }
 0x130   : > { %v4804_v5 = vpack.c.bf16 %v4032_v45, %v4031_v43  ;;  %v4910_v43 = vld [vmem:[%s4762_s22 + $0x84] ss:$8 sps:$4 sm:$0xff]   ;;  %v4918_v45 = vld [vmem:[%s4762_s22 + $0x94] ss:$8 sps:$4 sm:$0xff]  }
 0x131   : > { %v800_v46 = vpop.f32.mrf.mxu0  ;;  %5657 = vst [vmem:[#allocation25_spill] sm:$0xff] %v4910_v43  ;;  %5659 = vst [vmem:[#allocation27_spill] sm:$0xff] %v4918_v45 }
 0x132   : > { %v4810_v8 = vpack.c.bf16 %v800_v46, %v797_v44  ;;  %v871_v9 = vmax.bf16 %v4529_v19, %v4804_v5  ;;  %v4915_v44 = vld [vmem:[%s4762_s22 + $0x80] ss:$8 sps:$4 sm:$0xff]   ;;  %v4343_v46 = vld [vmem:[%s5573_s7 + $0x18] sm:$0xff]  }
 0x133   : > { %v4035_v47 = vpop.f32.mrf.mxu0  ;;  %5658 = vst [vmem:[#allocation26_spill] sm:$0xff] %v4915_v44 }
 0x134   : > { %v870_v13 = vmax.bf16 %v4529_v19, %v4810_v8 }
 0x135   : > { %v813_v48 = vpop.f32.mrf.mxu0 }
 0x137   : > { %v4036_v49 = vpop.f32.mrf.mxu0 }
 0x138   : > { %v4788_v61 = vpack.c.bf16 %v4036_v49, %v4035_v47  ;;  %v4926_v47 = vld [vmem:[%s4762_s22 + $0x90] ss:$8 sps:$4 sm:$0xff]  }
 0x139   : > { %v816_v50 = vpop.f32.mrf.mxu0  ;;  %5660 = vst [vmem:[#allocation28_spill] sm:$0xff] %v4926_v47  ;;  %v4344_v49 = vld [vmem:[%s5573_s7 + $0x10] sm:$0xff]  }
 0x13a   : > { %v4796_v1 = vpack.c.bf16 %v816_v50, %v813_v48  ;;  %v873_v2 = vmax.bf16 %v4529_v19, %v4788_v61  ;;  %v4929_v48 = vld [vmem:[%s4762_s22 + $0xa4] ss:$8 sps:$4 sm:$0xff]  }
 0x13b   : > { %v4039_v51 = vpop.f32.mrf.mxu0  ;;  %5661 = vst [vmem:[#allocation29_spill] sm:$0xff] %v4929_v48  ;;  %v4345_v50 = vld [vmem:[%s5573_s7 + $0x8] sm:$0xff]  }
 0x13c   : > { %v872_v6 = vmax.bf16 %v4529_v19, %v4796_v1 }
 0x13d   : > { %v829_v52 = vpop.f32.mrf.mxu0 }
 0x13f   : > { %v4040_v54 = vpop.f32.mrf.mxu0 }
 0x140   : > { %v4778_v55 = vpack.c.bf16 %v4040_v54, %v4039_v51  ;;  %v4940_v51 = vld [vmem:[%s4762_s22 + $0xa0] ss:$8 sps:$4 sm:$0xff]  }
 0x141   : > { %v832_v56 = vpop.f32.mrf.mxu0  ;;  %5662 = vst [vmem:[#allocation30_spill] sm:$0xff] %v4940_v51  ;;  %v4346_v54 = vld [vmem:[%s5573_s7] sm:$0xff]  }
 0x142   : > { %5647 = vst [vmem:[#allocation15_spill] sm:$0xff] %v4778_v55  ;;  %v4780_v57 = vpack.c.bf16 %v832_v56, %v829_v52  ;;  %v875_v58 = vmax.bf16 %v4529_v19, %v4778_v55  ;;  %v4943_v52 = vld [vmem:[%s4762_s22 + $0xb4] ss:$8 sps:$4 sm:$0xff]   ;;  %v4951_v56 = vld [vmem:[%s4762_s22 + $0xb0] ss:$8 sps:$4 sm:$0xff]  }
 0x143   : > { %5663 = vst [vmem:[#allocation31_spill] sm:$0xff] %v4943_v52  ;;  %5664 = vst [vmem:[#allocation32_spill] sm:$0xff] %v4951_v56 }
 0x144   : > { %3540 = vmatprep.subr.bf16.mxu1 %v875_v58  ;;  %v874_v62 = vmax.bf16 %v4529_v19, %v4780_v57  ;;  %v4342_v19 = vld [vmem:[%s5573_s7 + $0x20] sm:$0xff]  }
 0x145   : > { %3541 = vmatpush3.bf16.msra.mxu1 %v867_v60  ;;  %4047 = vmatprep.subr.bf16.mxu0 %v4342_v19  ;;  %v4954_v58 = vld [vmem:[%s4762_s22 + $0xc4] ss:$8 sps:$4 sm:$0xff]   ;;  %v4959_v60 = vld [vmem:[%s4762_s22 + $0xc0] ss:$8 sps:$4 sm:$0xff]  }
 0x146   : > { %3542 = vmatprep.subr.bf16.mxu1 %v874_v62  ;;  %4048 = vmatpush3.bf16.msra.mxu0 %v4342_v19  ;;  %5665 = vst [vmem:[#allocation33_spill] sm:$0xff] %v4954_v58  ;;  %5666 = vst [vmem:[#allocation34_spill] sm:$0xff] %v4959_v60  ;;  %v4962_v62 = vld [vmem:[%s4762_s22 + $0xd4] ss:$8 sps:$4 sm:$0xff]  }
 0x147   : > { %4049 = vmatprep.subr.bf16.mxu0 %v4343_v46  ;;  %5667 = vst [vmem:[#allocation35_spill] sm:$0xff] %v4962_v62 }
 0x149   : > { %3543 = vmatpush3.bf16.msra.mxu1 %v866_v0  ;;  %v4967_v0 = vld [vmem:[%s4762_s22 + $0xd0] ss:$8 sps:$4 sm:$0xff]  }
 0x14a   : > { %3544 = vmatprep.subr.bf16.mxu1 %v873_v2  ;;  %4050 = vmatpush3.bf16.msra.mxu0 %v4343_v46  ;;  %5668 = vst [vmem:[#allocation36_spill] sm:$0xff] %v4967_v0  ;;  %v4970_v2 = vld [vmem:[%s4762_s22 + $0xe4] ss:$8 sps:$4 sm:$0xff]  }
 0x14b   : > { %4051 = vmatprep.subr.bf16.mxu0 %v4344_v49  ;;  %5669 = vst [vmem:[#allocation37_spill] sm:$0xff] %v4970_v2 }
 0x14d   : > { %3545 = vmatpush3.bf16.msra.mxu1 %v865_v4  ;;  %v4975_v4 = vld [vmem:[%s4762_s22 + $0xe0] ss:$8 sps:$4 sm:$0xff]  }
 0x14e   : > { %3546 = vmatprep.subr.bf16.mxu1 %v872_v6  ;;  %4052 = vmatpush3.bf16.msra.mxu0 %v4344_v49  ;;  %5670 = vst [vmem:[#allocation38_spill] sm:$0xff] %v4975_v4  ;;  %v4978_v6 = vld [vmem:[%s4762_s22 + $0xf4] ss:$8 sps:$4 sm:$0xff]  }
 0x14f   : > { %4053 = vmatprep.subr.bf16.mxu0 %v4345_v50  ;;  %5671 = vst [vmem:[#allocation39_spill] sm:$0xff] %v4978_v6 }
 0x151   : > { %3547 = vmatpush3.bf16.msra.mxu1 %v864_v7  ;;  %v4983_v7 = vld [vmem:[%s4762_s22 + $0xf0] ss:$8 sps:$4 sm:$0xff]   ;;  %s4464_s22 = sshll.u32 %s4530_s21, 4  ;;  %s4465_s22 = int_to_ptr.vmem [resolvable:$false] %s4464_s22 }
 0x152   : > { %3548 = vmatprep.subr.bf16.mxu1 %v871_v9  ;;  %4054 = vmatpush3.bf16.msra.mxu0 %v4345_v50  ;;  %5672 = vst [vmem:[#allocation40_spill] sm:$0xff] %v4983_v7  ;;  %p4467_p7 = scmp.lt.s32.totalorder %s5517_s23, %s4465_s22 }
 0x153   : > { %4055 = vmatprep.subr.bf16.mxu0 %v4346_v54 }
 0x155   : > { %3549 = vmatpush3.bf16.msra.mxu1 %v863_v11 }
 0x156   : > { %3550 = vmatprep.subr.bf16.mxu1 %v870_v13  ;;  %4056 = vmatpush3.bf16.msra.mxu0 %v4346_v54 }
 0x159   : > { %3551 = vmatpush3.bf16.msra.mxu1 %v862_v14 }
 0x15a   : > { %3552 = vmatprep.subr.bf16.mxu1 %v869_v16 }
 0x15d   : > { %3553 = vmatpush3.bf16.msra.mxu1 %v861_v18 }
 0x15e   : > { %3554 = vmatprep.subr.bf16.mxu1 %v868_v21 }
 0x161   : > { %3555 = vmatpush3.bf16.msra.mxu1 %v860_v22 }
 0x162   : > { %4089 = vmatprep.subr.bf16.mxu1 %v4339_v23 }
 0x164   : > { %1101 = vmatmul.mubr.bf16.vlgmr.msra.gmra.mxu1 %v4845_v25 }
 0x165   : > { %1108 = vmatprep.mubr.bf16.mxu1 %v4851_v28  ;;  %4090 = vmatpush3.bf16.msra.mxu1 %v4339_v23 }
 0x166   : > { %4091 = vmatprep.subr.bf16.mxu1 %v4340_v26 }
 0x169   : > { %4092 = vmatpush3.bf16.msra.mxu1 %v4340_v26 }
 0x16a   : > { %4093 = vmatprep.subr.bf16.mxu1 %v4341_v27 }
 0x16c   : > { %1109 = vmatmul.mubr.bf16.gmra.mxu1 %v4859_v30 }
 0x16d   : > { %1116 = vmatprep.mubr.bf16.mxu1 %v4862_v31  ;;  %4094 = vmatpush3.bf16.msra.mxu1 %v4341_v27 }
 0x16e   : > { %4095 = vmatprep.subr.bf16.mxu1 %v4342_v19 }
 0x171   : > { %4096 = vmatpush3.bf16.msra.mxu1 %v4342_v19 }
 0x172   : > { %4097 = vmatprep.subr.bf16.mxu1 %v4343_v46 }
 0x174   : > { %1117 = vmatmul.mubr.bf16.gmra.mxu1 %v4867_v32 }
 0x175   : > { %1124 = vmatprep.mubr.bf16.mxu1 %v4870_v33  ;;  %4098 = vmatpush3.bf16.msra.mxu1 %v4343_v46 }
 0x176   : > { %4099 = vmatprep.subr.bf16.mxu1 %v4344_v49 }
 0x179   : > { %4100 = vmatpush3.bf16.msra.mxu1 %v4344_v49 }
 0x17a   : > { %4101 = vmatprep.subr.bf16.mxu1 %v4345_v50 }
 0x17c   : > { %1125 = vmatmul.mubr.bf16.gmra.mxu1 %v4875_v34 }
 0x17d   : > { %1132 = vmatprep.mubr.bf16.mxu1 %v4878_v35  ;;  %4102 = vmatpush3.bf16.msra.mxu1 %v4345_v50 }
 0x17e   : > { %4103 = vmatprep.subr.bf16.mxu1 %v4346_v54 }
 0x181   : > { %4104 = vmatpush3.bf16.msra.mxu1 %v4346_v54 }
 0x184   : > { %1133 = vmatmul.mubr.bf16.gmra.mxu1 %v4883_v36 }
 0x185   : > { %1140 = vmatprep.mubr.bf16.mxu1 %v4886_v37 }
 0x18c   : > { %1141 = vmatmul.mubr.bf16.gmra.mxu1 %v4891_v38 }
 0x18d   : > { %1148 = vmatprep.mubr.bf16.mxu1 %v4894_v39  ;;  %v1497_v39 = vunpack.c.h.bf16 %v4788_v61 }
 0x194   : > { %1149 = vmatmul.mubr.bf16.gmra.mxu1 %v4899_v40 }
 0x195   : > { %1156 = vmatprep.mubr.bf16.mxu1 %v4902_v41  ;;  %v5623_v41 = vunpack.c.h.bf16 %v4784_v59 }
 0x19c   : > { %1157 = vmatmul.mubr.bf16.gmra.mxu1 %v4907_v42 }
 0x19d   : > { %1164 = vmatprep.mubr.bf16.mxu1 %v4910_v43  ;;  %v5621_v43 = vunpack.c.h.bf16 %v4778_v55 }
 0x1a4   : > { %1165 = vmatmul.mubr.bf16.gmra.mxu1 %v4915_v44  ;;  %v5622_v44 = vunpack.c.l.bf16 %v4780_v57 }
 0x1a5   : > { %1172 = vmatprep.mubr.bf16.mxu1 %v4918_v45 }
 0x1ac   : > { %1173 = vmatmul.mubr.bf16.gmra.mxu1 %v4926_v47 }
 0x1ad   : > { %1180 = vmatprep.mubr.bf16.mxu1 %v4929_v48 }
 0x1b4   : > { %1181 = vmatmul.mubr.bf16.gmra.mxu1 %v4940_v51  ;;  %v5617_v51 = vunpack.c.l.bf16 %v4776_v53 }
 0x1b5   : > { %1188 = vmatprep.mubr.bf16.mxu1 %v4943_v52  ;;  %v5613_v52 = vunpack.c.l.bf16 %v4778_v55 }
 0x1bc   : > { %1189 = vmatmul.mubr.bf16.gmra.mxu1 %v4951_v56 }
 0x1bd   : > { %1196 = vmatprep.mubr.bf16.mxu1 %v4954_v58  ;;  %v5614_v58 = vunpack.c.h.bf16 %v4776_v53 }
 0x1c4   : > { %1197 = vmatmul.mubr.bf16.gmra.mxu1 %v4959_v60 }
 0x1c5   : > { %1204 = vmatprep.mubr.bf16.mxu1 %v4962_v62 }
 0x1cc   : > { %1205 = vmatmul.mubr.bf16.gmra.mxu1 %v4967_v0 }
 0x1cd   : > { %1212 = vmatprep.mubr.bf16.mxu1 %v4970_v2 }
 0x1d4   : > { %1213 = vmatmul.mubr.bf16.gmra.mxu1 %v4975_v4 }
 0x1d5   : > { %1220 = vmatprep.mubr.bf16.mxu1 %v4978_v6 }
 0x1dc   : > { %1221 = vmatmul.mubr.bf16.gmra.mxu1 %v4983_v7 }
 0x224   : > { %v3556_v9 = vpop.f32.mrf.mxu1 }
 0x226   : > { %v3557_v11 = vpop.f32.mrf.mxu1 }
 0x227   : > { %v3558_v16 = vadd.f32 %v3557_v11, %v3556_v9 }
 0x228   : > { %v3559_v13 = vpop.f32.mrf.mxu1 }
 0x22a   : > { %v3560_v14 = vpop.f32.mrf.mxu1 }
 0x22b   : > { %v3561_v18 = vadd.f32 %v3560_v14, %v3559_v13 }
 0x22c   : > { %v3562_v21 = vpop.f32.mrf.mxu1 }
 0x22d   : > { %v1229_v23 = vpack.c.bf16 %v3561_v18, %v3558_v16 }
 0x22e   : > { %v3563_v26 = vpop.f32.mrf.mxu1 }
 0x22f   : > { %4057 = vmatprep.mubr.bf16.mxu0 %v1229_v23  ;;  %v3564_v19 = vadd.f32 %v3563_v26, %v3562_v21 }
 0x230   : > { %v3565_v22 = vpop.f32.mrf.mxu1 }
 0x232   : > { %v3566_v27 = vpop.f32.mrf.mxu1 }
 0x233   : > { %v3567_v46 = vadd.f32 %v3566_v27, %v3565_v22 }
 0x234   : > { %v3568_v49 = vpop.f32.mrf.mxu1 }
 0x235   : > { %v1230_v50 = vpack.c.bf16 %v3567_v46, %v3564_v19 }
 0x236   : > { %v3569_v54 = vpop.f32.mrf.mxu1 }
 0x237   : > { %4058 = vmatmul.mubr.bf16.vlgmr.msra.gmra.mxu0 %v1230_v50  ;;  %v3570_v4 = vadd.f32 %v3569_v54, %v3568_v49 }
 0x238   : > { %v3571_v6 = vpop.f32.mrf.mxu1 }
 0x23a   : > { %v3572_v7 = vpop.f32.mrf.mxu1 }
 0x23b   : > { %v3573_v2 = vadd.f32 %v3572_v7, %v3571_v6 }
 0x23c   : > { %v3574_v0 = vpop.f32.mrf.mxu1 }
 0x23d   : > { %v1231_v62 = vpack.c.bf16 %v3573_v2, %v3570_v4 }
 0x23e   : > { %v3575_v9 = vpop.f32.mrf.mxu1 }
 0x23f   : > { %4061 = vmatprep.mubr.bf16.mxu0 %v1231_v62  ;;  %v3576_v14 = vadd.f32 %v3575_v9, %v3574_v0 }
 0x240   : > { %v3577_v11 = vpop.f32.mrf.mxu1 }
 0x242   : > { %v3578_v13 = vpop.f32.mrf.mxu1 }
 0x243   : > { %v3579_v16 = vadd.f32 %v3578_v13, %v3577_v11 }
 0x244   : > { %v3580_v18 = vpop.f32.mrf.mxu1 }
 0x245   : > { %v1232_v23 = vpack.c.bf16 %v3579_v16, %v3576_v14 }
 0x246   : > { %v3581_v21 = vpop.f32.mrf.mxu1 }
 0x247   : > { %4062 = vmatmul.mubr.bf16.gmra.mxu0 %v1232_v23  ;;  %v3582_v27 = vadd.f32 %v3581_v21, %v3580_v18 }
 0x248   : > { %v3583_v26 = vpop.f32.mrf.mxu1 }
 0x24a   : > { %v3584_v22 = vpop.f32.mrf.mxu1 }
 0x24b   : > { %v3585_v19 = vadd.f32 %v3584_v22, %v3583_v26 }
 0x24c   : > { %v3586_v46 = vpop.f32.mrf.mxu1 }
 0x24d   : > { %v1233_v50 = vpack.c.bf16 %v3585_v19, %v3582_v27 }
 0x24e   : > { %v3587_v49 = vpop.f32.mrf.mxu1 }
 0x24f   : > { %4065 = vmatprep.mubr.bf16.mxu0 %v1233_v50  ;;  %v3588_v4 = vadd.f32 %v3587_v49, %v3586_v46 }
 0x250   : > { %v3589_v6 = vpop.f32.mrf.mxu1 }
 0x252   : > { %v3590_v2 = vpop.f32.mrf.mxu1 }
 0x253   : > { %v3591_v62 = vadd.f32 %v3590_v2, %v3589_v6 }
 0x254   : > { %v3592_v7 = vpop.f32.mrf.mxu1 }
 0x255   : > { %v1234_v54 = vpack.c.bf16 %v3591_v62, %v3588_v4 }
 0x256   : > { %v3593_v0 = vpop.f32.mrf.mxu1 }
 0x257   : > { %4066 = vmatmul.mubr.bf16.gmra.mxu0 %v1234_v54  ;;  %v3594_v13 = vadd.f32 %v3593_v0, %v3592_v7 }
 0x258   : > { %v3595_v9 = vpop.f32.mrf.mxu1 }
 0x25a   : > { %v3596_v11 = vpop.f32.mrf.mxu1 }
 0x25b   : > { %v3597_v14 = vadd.f32 %v3596_v11, %v3595_v9 }
 0x25c   : > { %v3598_v16 = vpop.f32.mrf.mxu1 }
 0x25d   : > { %v1235_v23 = vpack.c.bf16 %v3597_v14, %v3594_v13 }
 0x25e   : > { %v3599_v18 = vpop.f32.mrf.mxu1 }
 0x25f   : > { %4069 = vmatprep.mubr.bf16.mxu0 %v1235_v23  ;;  %v3600_v22 = vadd.f32 %v3599_v18, %v3598_v16 }
 0x260   : > { %v3601_v21 = vpop.f32.mrf.mxu1 }
 0x262   : > { %v3602_v26 = vpop.f32.mrf.mxu1 }
 0x263   : > { %v3603_v27 = vadd.f32 %v3602_v26, %v3601_v21 }
 0x264   : > { %v3604_v19 = vpop.f32.mrf.mxu1 }
 0x265   : > { %v1236_v50 = vpack.c.bf16 %v3603_v27, %v3600_v22 }
 0x266   : > { %v3605_v46 = vpop.f32.mrf.mxu1 }
 0x267   : > { %4070 = vmatmul.mubr.bf16.gmra.mxu0 %v1236_v50  ;;  %v3606_v2 = vadd.f32 %v3605_v46, %v3604_v19 }
 0x268   : > { %v3607_v49 = vpop.f32.mrf.mxu1 }
 0x26a   : > { %v3608_v6 = vpop.f32.mrf.mxu1 }
 0x26b   : > { %v3609_v4 = vadd.f32 %v3608_v6, %v3607_v49 }
 0x26c   : > { %v3610_v62 = vpop.f32.mrf.mxu1 }
 0x26d   : > { %v1237_v54 = vpack.c.bf16 %v3609_v4, %v3606_v2 }
 0x26e   : > { %v3611_v7 = vpop.f32.mrf.mxu1 }
 0x26f   : > { %4073 = vmatprep.mubr.bf16.mxu0 %v1237_v54  ;;  %v3612_v11 = vadd.f32 %v3611_v7, %v3610_v62 }
 0x270   : > { %v3613_v0 = vpop.f32.mrf.mxu1 }
 0x272   : > { %v3614_v9 = vpop.f32.mrf.mxu1 }
 0x273   : > { %v3615_v13 = vadd.f32 %v3614_v9, %v3613_v0 }
 0x274   : > { %v3616_v14 = vpop.f32.mrf.mxu1 }
 0x275   : > { %v1238_v23 = vpack.c.bf16 %v3615_v13, %v3612_v11 }
 0x276   : > { %v3617_v16 = vpop.f32.mrf.mxu1 }
 0x277   : > { %4074 = vmatmul.mubr.bf16.gmra.mxu0 %v1238_v23  ;;  %v3618_v26 = vadd.f32 %v3617_v16, %v3616_v14 }
 0x278   : > { %v3619_v18 = vpop.f32.mrf.mxu1 }
 0x27a   : > { %v3620_v21 = vpop.f32.mrf.mxu1 }
 0x27b   : > { %v3621_v22 = vadd.f32 %v3620_v21, %v3619_v18 }
 0x27c   : > { %v3622_v27 = vpop.f32.mrf.mxu1 }
 0x27d   : > { %v1239_v50 = vpack.c.bf16 %v3621_v22, %v3618_v26 }
 0x27e   : > { %v3623_v19 = vpop.f32.mrf.mxu1 }
 0x27f   : > { %4077 = vmatprep.mubr.bf16.mxu0 %v1239_v50  ;;  %v3624_v6 = vadd.f32 %v3623_v19, %v3622_v27 }
 0x280   : > { %v3625_v46 = vpop.f32.mrf.mxu1 }
 0x282   : > { %v3626_v49 = vpop.f32.mrf.mxu1 }
 0x283   : > { %v3627_v2 = vadd.f32 %v3626_v49, %v3625_v46 }
 0x284   : > { %v3628_v4 = vpop.f32.mrf.mxu1 }
 0x285   : > { %v1240_v54 = vpack.c.bf16 %v3627_v2, %v3624_v6 }
 0x286   : > { %v3629_v62 = vpop.f32.mrf.mxu1 }
 0x287   : > { %4078 = vmatmul.mubr.bf16.gmra.mxu0 %v1240_v54  ;;  %v3630_v9 = vadd.f32 %v3629_v62, %v3628_v4 }
 0x288   : > { %v3631_v7 = vpop.f32.mrf.mxu1 }
 0x28a   : > { %v3632_v0 = vpop.f32.mrf.mxu1 }
 0x28b   : > { %v3633_v11 = vadd.f32 %v3632_v0, %v3631_v7 }
 0x28c   : > { %v3634_v13 = vpop.f32.mrf.mxu1 }
 0x28d   : > { %v1241_v23 = vpack.c.bf16 %v3633_v11, %v3630_v9 }
 0x28e   : > { %v3635_v14 = vpop.f32.mrf.mxu1 }
 0x28f   : > { %4081 = vmatprep.mubr.bf16.mxu0 %v1241_v23  ;;  %v3636_v21 = vadd.f32 %v3635_v14, %v3634_v13  ;;  %v5593_v23 = vunpack.c.l.bf16 %v4770_v24 }
 0x290   : > { %v3637_v16 = vpop.f32.mrf.mxu1 }
 0x292   : > { %v3638_v18 = vpop.f32.mrf.mxu1 }
 0x293   : > { %v3639_v26 = vadd.f32 %v3638_v18, %v3637_v16  ;;  %v5591_v18 = vunpack.c.h.bf16 %v4770_v24 }
 0x294   : > { %v3640_v22 = vpop.f32.mrf.mxu1 }
 0x295   : > { %v1242_v50 = vpack.c.bf16 %v3639_v26, %v3636_v21 }
 0x296   : > { %v3641_v27 = vpop.f32.mrf.mxu1 }
 0x297   : > { %4082 = vmatmul.mubr.bf16.gmra.mxu0 %v1242_v50  ;;  %v3642_v49 = vadd.f32 %v3641_v27, %v3640_v22 }
 0x298   : > { %v3643_v19 = vpop.f32.mrf.mxu1 }
 0x29a   : > { %v3644_v46 = vpop.f32.mrf.mxu1 }
 0x29b   : > { %v3645_v6 = vadd.f32 %v3644_v46, %v3643_v19  ;;  %v5590_v46 = vunpack.c.l.bf16 %v4774_v29 }
 0x29c   : > { %v3646_v2 = vpop.f32.mrf.mxu1 }
 0x29d   : > { %v1243_v54 = vpack.c.bf16 %v3645_v6, %v3642_v49 }
 0x29e   : > { %v3647_v4 = vpop.f32.mrf.mxu1 }
 0x29f   : > { %4085 = vmatprep.mubr.bf16.mxu0 %v1243_v54  ;;  %v3648_v0 = vadd.f32 %v3647_v4, %v3646_v2  ;;  %v5592_v2 = vunpack.c.h.bf16 %v4774_v29 }
 0x2a0   : > { %v3649_v62 = vpop.f32.mrf.mxu1 }
 0x2a2   : > { %v3650_v7 = vpop.f32.mrf.mxu1 }
 0x2a3   : > { %v3651_v9 = vadd.f32 %v3650_v7, %v3649_v62 }
 0x2a5   : > { %v1244_v11 = vpack.c.bf16 %v3651_v9, %v3648_v0 }
 0x2a7   : > { %4086 = vmatmul.mubr.bf16.gmra.mxu0 %v1244_v11 }
 0x2a8   : > { %1614 = vmatprep.mubr.bf16.mxu0 %v4765_v20 }
 0x2f7   : > { %v4059_v13 = vpop.f32.mrf.mxu0 }
 0x2f8   : > { %v1504_v16 = vadd.f32 %v4059_v13, %v5593_v23 }
 0x2f9   : > { %v4988_v14 = vpop.f32.mrf.mxu0 }
 0x2fa   : > { %v1536_v22 = vmax.f32 %v1504_v16, 0.0 }
 0x2fb   : > { %v4060_v21 = vpop.f32.mrf.mxu0 }
 0x2fc   : > { %v1505_v26 = vadd.f32 %v4060_v21, %v5591_v18 }
 0x2fd   : > { %v4997_v19 = vpop.f32.mrf.mxu0 }
 0x2fe   : > { %v1537_v50 = vmax.f32 %v1505_v26, 0.0 }
 0x300   : > { %v4995_v27 = vpack.c.bf16 %v1537_v50, %v1536_v22 }
 0x307   : > { %v4063_v20 = vpop.f32.mrf.mxu0 }
 0x308   : > { %v1508_v6 = vadd.f32 %v4063_v20, %v5590_v46 }
 0x309   : > { %v5000_v49 = vpop.f32.mrf.mxu0 }
 0x30a   : > { %v1540_v62 = vmax.f32 %v1508_v6, 0.0 }
 0x30b   : > { %v4064_v54 = vpop.f32.mrf.mxu0 }
 0x30c   : > { %v1509_v4 = vadd.f32 %v4064_v54, %v5592_v2 }
 0x30d   : > { %v5009_v9 = vpop.f32.mrf.mxu0 }
 0x30e   : > { %v1541_v7 = vmax.f32 %v1509_v4, 0.0 }
 0x310   : > { %v5007_v0 = vpack.c.bf16 %v1541_v7, %v1540_v62 }
 0x317   : > { %v4067_v11 = vpop.f32.mrf.mxu0 }
 0x319   : > { %v5011_v13 = vpop.f32.mrf.mxu0 }
 0x31b   : > { %v4068_v16 = vpop.f32.mrf.mxu0 }
 0x31d   : > { %v5013_v21 = vpop.f32.mrf.mxu0 }
 0x327   : > { %v4071_v26 = vpop.f32.mrf.mxu0 }
 0x328   : > { %v1516_v42 = vadd.f32 %v4071_v26, %v5617_v51  ;;  %v1496_v26 = vunpack.c.l.bf16 %v4788_v61 }
 0x329   : > { %v1391_v22 = vpop.f32.mrf.mxu0 }
 0x32b   : > { %v4072_v50 = vpop.f32.mrf.mxu0 }
 0x32c   : > { %v1517_v48 = vadd.f32 %v4072_v50, %v5614_v58 }
 0x32d   : > { %v1394_v20 = vpop.f32.mrf.mxu0 }
 0x32e   : > { %v1549_v58 = vmax.f32 %v1517_v48, 0.0  ;;  %v1515_v53 = vadd.f32 %v5623_v41, %v1394_v20 }
 0x337   : > { %v5015_v46 = vpop.f32.mrf.mxu0 }
 0x339   : > { %v5017_v18 = vpop.f32.mrf.mxu0 }
 0x33b   : > { %v5019_v6 = vpop.f32.mrf.mxu0 }
 0x33d   : > { %v5021_v54 = vpop.f32.mrf.mxu0 }
 0x347   : > { %v5023_v4 = vpop.f32.mrf.mxu0 }
 0x349   : > { %v5025_v62 = vpop.f32.mrf.mxu0 }
 0x34b   : > { %v4080_v7 = vpop.f32.mrf.mxu0 }
 0x34d   : > { %v5027_v2 = vpop.f32.mrf.mxu0 }
 0x357   : > { %v4083_v23 = vpop.f32.mrf.mxu0 }
 0x358   : > { %v1528_v20 = vadd.f32 %v4083_v23, %v1496_v26  ;;  %v1493_v23 = vunpack.c.h.bf16 %v4804_v5 }
 0x359   : > { %v1439_v29 = vpop.f32.mrf.mxu0 }
 0x35b   : > { %v4084_v24 = vpop.f32.mrf.mxu0 }
 0x35c   : > { %v1529_v37 = vadd.f32 %v4084_v24, %v1497_v39  ;;  %v1480_v24 = vunpack.c.l.bf16 %v4792_v63 }
 0x35d   : > { %v1442_v60 = vpop.f32.mrf.mxu0 }
 0x367   : > { %v4087_v56 = vpop.f32.mrf.mxu0 }
 0x368   : > { %v1532_v45 = vadd.f32 %v4087_v56, %v5613_v52  ;;  %v5627_v56 = vunpack.c.h.bf16 %v4780_v57  ;;  %v5628_v52 = vunpack.c.l.bf16 %v4784_v59 }
 0x369   : > { %v1455_v47 = vpop.f32.mrf.mxu0 }
 0x36a   : > { %v1530_v38 = vadd.f32 %v5622_v44, %v1455_v47  ;;  %v1564_v36 = vmax.f32 %v1532_v45, 0.0  ;;  %v1514_v48 = vadd.f32 %v5628_v52, %v1391_v22  ;;  %v1495_v44 = vunpack.c.h.bf16 %v4796_v1 }
 0x36b   : > { %v4088_v40 = vpop.f32.mrf.mxu0 }
 0x36c   : > { %v1533_v50 = vadd.f32 %v4088_v40, %v5621_v43  ;;  %v1481_v40 = vunpack.c.h.bf16 %v4792_v63  ;;  %v1548_v43 = vmax.f32 %v1516_v42, 0.0  ;;  %v1562_v41 = vmax.f32 %v1530_v38, 0.0 }
 0x36d   : > { %v1458_v51 = vpop.f32.mrf.mxu0  ;;  %v1494_v42 = vunpack.c.l.bf16 %v4796_v1  ;;  %v1527_v22 = vadd.f32 %v1495_v44, %v1442_v60  ;;  %v1512_v38 = vadd.f32 %v4067_v11, %v1480_v24 }
 0x36e   : > { %v1565_v35 = vmax.f32 %v1533_v50, 0.0  ;;  %v1531_v47 = vadd.f32 %v5627_v56, %v1458_v51  ;;  %v1513_v45 = vadd.f32 %v4068_v16, %v1481_v40  ;;  %v1573_v51 = vpack.c.bf16 %v1549_v58, %v1548_v43 }
 0x36f   : > { %v1547_v50 = vmax.f32 %v1515_v53, 0.0  ;;  %v1561_v56 = vmax.f32 %v1529_v37, 0.0  ;;  %v1560_v16 = vmax.f32 %v1528_v20, 0.0  ;;  %v1526_v53 = vadd.f32 %v1494_v42, %v1439_v29 }
 0x370   : > { %v1581_v55 = vpack.c.bf16 %v1565_v35, %v1564_v36  ;;  %v1563_v34 = vmax.f32 %v1531_v47, 0.0  ;;  %v1479_v35 = vunpack.c.h.bf16 %v4800_v3  ;;  %v1546_v36 = vmax.f32 %v1514_v48, 0.0 }
 0x371   : > { %v1478_v37 = vunpack.c.l.bf16 %v4800_v3  ;;  %v1545_v43 = vmax.f32 %v1513_v45, 0.0  ;;  %v1525_v58 = vadd.f32 %v4080_v7, %v1493_v23  ;;  %v1579_v60 = vpack.c.bf16 %v1561_v56, %v1560_v16 }
 0x372   : > { %3676 = vmatprep.subr.bf16.mxu0 %v1581_v55  ;;  %v1580_v52 = vpack.c.bf16 %v1563_v34, %v1562_v41  ;;  %v1511_v55 = vadd.f32 %v1479_v35, %v5013_v21  ;;  %v1572_v34 = vpack.c.bf16 %v1547_v50, %v1546_v36  ;;  %v1492_v41 = vunpack.c.l.bf16 %v4804_v5 }
 0x373   : > { %3677 = vmatpush3.bf16.msra.mxu0 %v1573_v51  ;;  %v1559_v11 = vmax.f32 %v1527_v22, 0.0  ;;  %v1544_v47 = vmax.f32 %v1512_v38, 0.0  ;;  %v1510_v29 = vadd.f32 %v1478_v37, %v5011_v13  ;;  %v1491_v21 = vunpack.c.h.bf16 %v4810_v8 }
 0x374   : > { %3678 = vmatprep.subr.bf16.mxu0 %v1580_v52  ;;  %v1524_v52 = vadd.f32 %v5023_v4, %v1492_v41  ;;  %v1558_v48 = vmax.f32 %v1526_v53, 0.0  ;;  %v1543_v45 = vmax.f32 %v1511_v55, 0.0  ;;  %v5633_v7 = vunpack.c.l.bf16 %v4810_v8 }
 0x375   : > { %v1571_v20 = vpack.c.bf16 %v1545_v43, %v1544_v47  ;;  %v1557_v56 = vmax.f32 %v1525_v58, 0.0  ;;  %v1523_v51 = vadd.f32 %v1491_v21, %v5027_v2  ;;  %v1475_v13 = vunpack.c.h.bf16 %v4814_v10 }
 0x376   : > { %v1578_v50 = vpack.c.bf16 %v1559_v11, %v1558_v48  ;;  %v1542_v22 = vmax.f32 %v1510_v29, 0.0  ;;  %v5632_v4 = vunpack.c.h.bf16 %v4818_v12  ;;  %v1556_v38 = vmax.f32 %v1524_v52, 0.0 }
 0x377   : > { %3679 = vmatpush3.bf16.msra.mxu0 %v1572_v34  ;;  %v1522_v36 = vadd.f32 %v5633_v7, %v5025_v62  ;;  %v1474_v16 = vunpack.c.l.bf16 %v4814_v10  ;;  %v1507_v53 = vadd.f32 %v1475_v13, %v5009_v9  ;;  %v5631_v43 = vunpack.c.l.bf16 %v4818_v12 }
 0x378   : > { %3680 = vmatprep.subr.bf16.mxu0 %v1579_v60  ;;  %v1570_v2 = vpack.c.bf16 %v1543_v45, %v1542_v22  ;;  %v1521_v55 = vadd.f32 %v5019_v6, %v5632_v4  ;;  %v1577_v34 = vpack.c.bf16 %v1557_v56, %v1556_v38  ;;  %v1555_v58 = vmax.f32 %v1523_v51, 0.0 }
 0x379   : > { %v1506_v62 = vadd.f32 %v1474_v16, %v5000_v49  ;;  %v1520_v60 = vadd.f32 %v5015_v46, %v5631_v43  ;;  %v5630_v9 = vunpack.c.h.bf16 %v4824_v15  ;;  %v1554_v11 = vmax.f32 %v1522_v36, 0.0 }
 0x37a   : > { %v1539_v47 = vmax.f32 %v1507_v53, 0.0  ;;  %v5629_v29 = vunpack.c.l.bf16 %v4824_v15  ;;  %v1553_v52 = vmax.f32 %v1521_v55, 0.0  ;;  %v1471_v49 = vunpack.c.h.bf16 %v4830_v17  ;;  %v5676_v55 = vld [vmem:[#allocation19_spill] sm:$0xff] }
 0x37b   : > { %3681 = vmatpush3.bf16.msra.mxu0 %v1571_v20  ;;  %v1519_v6 = vadd.f32 %v5630_v9, %v5021_v54  ;;  %v1576_v48 = vpack.c.bf16 %v1555_v58, %v1554_v11  ;;  %v1538_v20 = vmax.f32 %v1506_v62, 0.0  ;;  %v1552_v45 = vmax.f32 %v1520_v60, 0.0  ;;  %v5684_v58 = vld [vmem:[#allocation27_spill] sm:$0xff]  ;;  %v5685_v62 = vld [vmem:[#allocation28_spill] sm:$0xff]  ;;  %v5686_v60 = vld [vmem:[#allocation29_spill] sm:$0xff] }
 0x37c   : > { %3682 = vmatprep.subr.bf16.mxu0 %v1578_v50  ;;  %v1518_v46 = vadd.f32 %v5629_v29, %v5017_v18  ;;  %v1470_v56 = vunpack.c.l.bf16 %v4830_v17  ;;  %v1503_v51 = vadd.f32 %v1471_v49, %v4997_v19  ;;  %v5674_v19 = vld [vmem:[#allocation17_spill] sm:$0xff]  ;;  %v5687_v11 = vld [vmem:[#allocation30_spill] sm:$0xff]  ;;  %v5711_v43 = vunpack.c.h.bf16 %v4784_v59 }
 0x37d   : > { %v1568_v50 = vpack.c.bf16 %v1539_v47, %v1538_v20  ;;  %v1575_v54 = vpack.c.bf16 %v1553_v52, %v1552_v45  ;;  %v1551_v22 = vmax.f32 %v1519_v6, 0.0  ;;  %v5688_v47 = vld [vmem:[#allocation31_spill] sm:$0xff]  ;;  %v5689_v52 = vld [vmem:[#allocation32_spill] sm:$0xff]  ;;  %v5690_v6 = vld [vmem:[#allocation33_spill] sm:$0xff]  ;;  %v5715_v5 = vunpack.c.h.bf16 %v4818_v12 }
 0x37e   : > { %v1502_v38 = vadd.f32 %v1470_v56, %v4988_v14  ;;  %v1535_v36 = vmax.f32 %v1503_v51, 0.0  ;;  %v5673_v14 = vld [vmem:[#allocation16_spill] sm:$0xff]  ;;  %v5692_v20 = vld [vmem:[#allocation35_spill] sm:$0xff]  ;;  %v5695_v51 = vld [vmem:[#allocation38_spill] sm:$0xff] }
 0x37f   : > { %3683 = vmatpush3.bf16.msra.mxu0 %v1570_v2  ;;  %v5693_v45 = vld [vmem:[#allocation36_spill] sm:$0xff] }
 0x380   : > { %3684 = vmatprep.subr.bf16.mxu0 %v1577_v34  ;;  %v1534_v18 = vmax.f32 %v1502_v38, 0.0  ;;  %v5677_v34 = vld [vmem:[#allocation20_spill] sm:$0xff] }
 0x382   : > { %v1566_v2 = vpack.c.bf16 %v1535_v36, %v1534_v18 }
 0x383   : > { %3685 = vmatpush3.bf16.msra.mxu0 %v5007_v0  ;;  %v1550_v0 = vmax.f32 %v1518_v46, 0.0  ;;  %v5694_v46 = vld [vmem:[#allocation37_spill] sm:$0xff] }
 0x384   : > { %3686 = vmatprep.subr.bf16.mxu0 %v1576_v48  ;;  %v5691_v48 = vld [vmem:[#allocation34_spill] sm:$0xff] }
 0x385   : > { %v1574_v53 = vpack.c.bf16 %v1551_v22, %v1550_v0 }
 0x387   : > { %3687 = vmatpush3.bf16.msra.mxu0 %v1568_v50  ;;  %v5696_v50 = vld [vmem:[#allocation39_spill] sm:$0xff] }
 0x388   : > { %3688 = vmatprep.subr.bf16.mxu0 %v1575_v54  ;;  %v5697_v54 = vld [vmem:[#allocation40_spill] sm:$0xff] }
 0x38b   : > { %3689 = vmatpush3.bf16.msra.mxu0 %v4995_v27  ;;  %v5675_v27 = vld [vmem:[#allocation18_spill] sm:$0xff] }
 0x38c   : > { %3690 = vmatprep.subr.bf16.mxu0 %v1574_v53 }
 0x38f   : > { %3691 = vmatpush3.bf16.msra.mxu0 %v1566_v2 }
 0x392   : > { %1615 = vmatmul.mubr.bf16.vlgmr.msra.gmra.mxu0 %v4845_v25  ;;  %v5678_v25 = vld [vmem:[#allocation21_spill] sm:$0xff] }
 0x393   : > { %1622 = vmatprep.mubr.bf16.mxu0 %v4851_v28  ;;  %v5679_v28 = vld [vmem:[#allocation22_spill] sm:$0xff] }
 0x39a   : > { %1623 = vmatmul.mubr.bf16.gmra.mxu0 %v4859_v30  ;;  %v5680_v30 = vld [vmem:[#allocation23_spill] sm:$0xff] }
 0x39b   : > { %1630 = vmatprep.mubr.bf16.mxu0 %v4862_v31  ;;  %v5681_v31 = vld [vmem:[#allocation24_spill] sm:$0xff] }
 0x3a2   : > { %1631 = vmatmul.mubr.bf16.gmra.mxu0 %v4867_v32  ;;  %v5682_v32 = vld [vmem:[#allocation25_spill] sm:$0xff] }
 0x3a3   : > { %1638 = vmatprep.mubr.bf16.mxu0 %v4870_v33  ;;  %v5683_v33 = vld [vmem:[#allocation26_spill] sm:$0xff] }
 0x3aa   : > { %1639 = vmatmul.mubr.bf16.gmra.mxu0 %v5673_v14 }
 0x3ab   : > { %1646 = vmatprep.mubr.bf16.mxu0 %v5674_v19 }
 0x3b2   : > { %1647 = vmatmul.mubr.bf16.gmra.mxu0 %v5675_v27 }
 0x3b3   : > { %1654 = vmatprep.mubr.bf16.mxu0 %v5676_v55 }
 0x3ba   : > { %1655 = vmatmul.mubr.bf16.gmra.mxu0 %v5677_v34 }
 0x3bb   : > { %1662 = vmatprep.mubr.bf16.mxu0 %v5678_v25 }
 0x3c2   : > { %1663 = vmatmul.mubr.bf16.gmra.mxu0 %v5679_v28 }
 0x3c3   : > { %1670 = vmatprep.mubr.bf16.mxu0 %v5680_v30 }
 0x3ca   : > { %1671 = vmatmul.mubr.bf16.gmra.mxu0 %v5681_v31 }
 0x3cb   : > { %1678 = vmatprep.mubr.bf16.mxu0 %v5682_v32 }
 0x3d2   : > { %1679 = vmatmul.mubr.bf16.gmra.mxu0 %v5683_v33 }
 0x3d3   : > { %1686 = vmatprep.mubr.bf16.mxu0 %v5684_v58 }
 0x3da   : > { %1687 = vmatmul.mubr.bf16.gmra.mxu0 %v5685_v62 }
 0x3db   : > { %1694 = vmatprep.mubr.bf16.mxu0 %v5686_v60 }
 0x3e2   : > { %1695 = vmatmul.mubr.bf16.gmra.mxu0 %v5687_v11 }
 0x3e3   : > { %1702 = vmatprep.mubr.bf16.mxu0 %v5688_v47 }
 0x3ea   : > { %1703 = vmatmul.mubr.bf16.gmra.mxu0 %v5689_v52 }
 0x3eb   : > { %1710 = vmatprep.mubr.bf16.mxu0 %v5690_v6 }
 0x3f2   : > { %1711 = vmatmul.mubr.bf16.gmra.mxu0 %v5691_v48 }
 0x3f3   : > { %1718 = vmatprep.mubr.bf16.mxu0 %v5692_v20 }
 0x3fa   : > { %1719 = vmatmul.mubr.bf16.gmra.mxu0 %v5693_v45 }
 0x3fb   : > { %1726 = vmatprep.mubr.bf16.mxu0 %v5694_v46 }
 0x402   : > { %1727 = vmatmul.mubr.bf16.gmra.mxu0 %v5695_v51 }
 0x403   : > { %1734 = vmatprep.mubr.bf16.mxu0 %v5696_v50 }
 0x40a   : > { %1735 = vmatmul.mubr.bf16.gmra.mxu0 %v5697_v54 }
 0x452   : > { %v3692_v22 = vpop.f32.mrf.mxu0 }
 0x454   : > { %v3693_v38 = vpop.f32.mrf.mxu0 }
 0x455   : > { %v3694_v53 = vadd.f32 %v3693_v38, %v3692_v22 }
 0x456   : > { %v3695_v0 = vpop.f32.mrf.mxu0 }
 0x458   : > { %v3696_v36 = vpop.f32.mrf.mxu0 }
 0x459   : > { %v3697_v18 = vadd.f32 %v3696_v36, %v3695_v0 }
 0x45a   : > { %v3698_v2 = vpop.f32.mrf.mxu0 }
 0x45b   : > { %v1743_v14 = vpack.c.bf16 %v3697_v18, %v3694_v53 }
 0x45c   : > { %v3699_v19 = vpop.f32.mrf.mxu0 }
 0x45d   : > { %4105 = vmatprep.mubr.bf16.mxu1 %v1743_v14  ;;  %v3700_v34 = vadd.f32 %v3699_v19, %v3698_v2 }
 0x45e   : > { %v3701_v27 = vpop.f32.mrf.mxu0 }
 0x460   : > { %v3702_v55 = vpop.f32.mrf.mxu0 }
 0x461   : > { %v3703_v25 = vadd.f32 %v3702_v55, %v3701_v27 }
 0x462   : > { %v3704_v28 = vpop.f32.mrf.mxu0 }
 0x463   : > { %v1744_v30 = vpack.c.bf16 %v3703_v25, %v3700_v34 }
 0x464   : > { %v3705_v31 = vpop.f32.mrf.mxu0 }
 0x465   : > { %4106 = vmatmul.mubr.bf16.vlgmr.msra.gmra.mxu1 %v1744_v30  ;;  %v3706_v58 = vadd.f32 %v3705_v31, %v3704_v28 }
 0x466   : > { %v3707_v32 = vpop.f32.mrf.mxu0 }
 0x468   : > { %v3708_v33 = vpop.f32.mrf.mxu0 }
 0x469   : > { %v3709_v62 = vadd.f32 %v3708_v33, %v3707_v32 }
 0x46a   : > { %v3710_v60 = vpop.f32.mrf.mxu0 }
 0x46b   : > { %v1745_v11 = vpack.c.bf16 %v3709_v62, %v3706_v58 }
 0x46c   : > { %v3711_v47 = vpop.f32.mrf.mxu0 }
 0x46d   : > { %4109 = vmatprep.mubr.bf16.mxu1 %v1745_v11  ;;  %v3712_v48 = vadd.f32 %v3711_v47, %v3710_v60 }
 0x46e   : > { %v3713_v52 = vpop.f32.mrf.mxu0 }
 0x470   : > { %v3714_v6 = vpop.f32.mrf.mxu0 }
 0x471   : > { %v3715_v20 = vadd.f32 %v3714_v6, %v3713_v52 }
 0x472   : > { %v3716_v45 = vpop.f32.mrf.mxu0 }
 0x473   : > { %v1746_v46 = vpack.c.bf16 %v3715_v20, %v3712_v48 }
 0x474   : > { %v3717_v51 = vpop.f32.mrf.mxu0 }
 0x475   : > { %4110 = vmatmul.mubr.bf16.gmra.mxu1 %v1746_v46  ;;  %v3718_v22 = vadd.f32 %v3717_v51, %v3716_v45 }
 0x476   : > { %v3719_v50 = vpop.f32.mrf.mxu0 }
 0x478   : > { %v3720_v54 = vpop.f32.mrf.mxu0 }
 0x479   : > { %v3721_v38 = vadd.f32 %v3720_v54, %v3719_v50 }
 0x47a   : > { %v3722_v0 = vpop.f32.mrf.mxu0 }
 0x47b   : > { %v1747_v36 = vpack.c.bf16 %v3721_v38, %v3718_v22 }
 0x47c   : > { %v3723_v53 = vpop.f32.mrf.mxu0 }
 0x47d   : > { %4113 = vmatprep.mubr.bf16.mxu1 %v1747_v36  ;;  %v3724_v14 = vadd.f32 %v3723_v53, %v3722_v0 }
 0x47e   : > { %v3725_v18 = vpop.f32.mrf.mxu0 }
 0x480   : > { %v3726_v2 = vpop.f32.mrf.mxu0 }
 0x481   : > { %v3727_v19 = vadd.f32 %v3726_v2, %v3725_v18 }
 0x482   : > { %v3728_v27 = vpop.f32.mrf.mxu0 }
 0x483   : > { %v1748_v55 = vpack.c.bf16 %v3727_v19, %v3724_v14 }
 0x484   : > { %v3729_v34 = vpop.f32.mrf.mxu0 }
 0x485   : > { %4114 = vmatmul.mubr.bf16.gmra.mxu1 %v1748_v55  ;;  %v3730_v30 = vadd.f32 %v3729_v34, %v3728_v27 }
 0x486   : > { %v3731_v25 = vpop.f32.mrf.mxu0 }
 0x488   : > { %v3732_v28 = vpop.f32.mrf.mxu0 }
 0x489   : > { %v3733_v31 = vadd.f32 %v3732_v28, %v3731_v25 }
 0x48a   : > { %v3734_v32 = vpop.f32.mrf.mxu0 }
 0x48b   : > { %v1749_v33 = vpack.c.bf16 %v3733_v31, %v3730_v30 }
 0x48c   : > { %v3735_v58 = vpop.f32.mrf.mxu0 }
 0x48d   : > { %4117 = vmatprep.mubr.bf16.mxu1 %v1749_v33  ;;  %v3736_v11 = vadd.f32 %v3735_v58, %v3734_v32 }
 0x48e   : > { %v3737_v62 = vpop.f32.mrf.mxu0 }
 0x490   : > { %v3738_v60 = vpop.f32.mrf.mxu0 }
 0x491   : > { %v3739_v47 = vadd.f32 %v3738_v60, %v3737_v62 }
 0x492   : > { %v3740_v52 = vpop.f32.mrf.mxu0 }
 0x493   : > { %v1750_v6 = vpack.c.bf16 %v3739_v47, %v3736_v11 }
 0x494   : > { %v3741_v48 = vpop.f32.mrf.mxu0 }
 0x495   : > { %4118 = vmatmul.mubr.bf16.gmra.mxu1 %v1750_v6  ;;  %v3742_v46 = vadd.f32 %v3741_v48, %v3740_v52 }
 0x496   : > { %v3743_v20 = vpop.f32.mrf.mxu0 }
 0x498   : > { %v3744_v45 = vpop.f32.mrf.mxu0 }
 0x499   : > { %v3745_v51 = vadd.f32 %v3744_v45, %v3743_v20 }
 0x49a   : > { %v3746_v50 = vpop.f32.mrf.mxu0 }
 0x49b   : > { %v1751_v54 = vpack.c.bf16 %v3745_v51, %v3742_v46 }
 0x49c   : > { %v3747_v22 = vpop.f32.mrf.mxu0 }
 0x49d   : > { %4121 = vmatprep.mubr.bf16.mxu1 %v1751_v54  ;;  %v3748_v36 = vadd.f32 %v3747_v22, %v3746_v50 }
 0x49e   : > { %v3749_v38 = vpop.f32.mrf.mxu0 }
 0x4a0   : > { %v3750_v0 = vpop.f32.mrf.mxu0 }
 0x4a1   : > { %v3751_v53 = vadd.f32 %v3750_v0, %v3749_v38 }
 0x4a2   : > { %v3752_v18 = vpop.f32.mrf.mxu0 }
 0x4a3   : > { %v1752_v2 = vpack.c.bf16 %v3751_v53, %v3748_v36 }
 0x4a4   : > { %v3753_v14 = vpop.f32.mrf.mxu0 }
 0x4a5   : > { %4122 = vmatmul.mubr.bf16.gmra.mxu1 %v1752_v2  ;;  %v3754_v55 = vadd.f32 %v3753_v14, %v3752_v18 }
 0x4a6   : > { %v3755_v19 = vpop.f32.mrf.mxu0 }
 0x4a8   : > { %v3756_v27 = vpop.f32.mrf.mxu0 }
 0x4a9   : > { %v3757_v34 = vadd.f32 %v3756_v27, %v3755_v19 }
 0x4aa   : > { %v3758_v25 = vpop.f32.mrf.mxu0 }
 0x4ab   : > { %v1753_v28 = vpack.c.bf16 %v3757_v34, %v3754_v55 }
 0x4ac   : > { %v3759_v30 = vpop.f32.mrf.mxu0 }
 0x4ad   : > { %4125 = vmatprep.mubr.bf16.mxu1 %v1753_v28  ;;  %v3760_v33 = vadd.f32 %v3759_v30, %v3758_v25 }
 0x4ae   : > { %v3761_v31 = vpop.f32.mrf.mxu0 }
 0x4b0   : > { %v3762_v32 = vpop.f32.mrf.mxu0 }
 0x4b1   : > { %v3763_v58 = vadd.f32 %v3762_v32, %v3761_v31 }
 0x4b2   : > { %v3764_v62 = vpop.f32.mrf.mxu0 }
 0x4b3   : > { %v1754_v60 = vpack.c.bf16 %v3763_v58, %v3760_v33  ;;  %v5698_v58 = vld [vmem:[#allocation12_spill] sm:$0xff] }
 0x4b4   : > { %v3765_v11 = vpop.f32.mrf.mxu0 }
 0x4b5   : > { %4126 = vmatmul.mubr.bf16.gmra.mxu1 %v1754_v60  ;;  %v3766_v6 = vadd.f32 %v3765_v11, %v3764_v62  ;;  %v5699_v62 = vunpack.c.l.bf16 %v5698_v58 }
 0x4b6   : > { %v3767_v47 = vpop.f32.mrf.mxu0 }
 0x4b8   : > { %v3768_v52 = vpop.f32.mrf.mxu0 }
 0x4b9   : > { %v3769_v48 = vadd.f32 %v3768_v52, %v3767_v47  ;;  %v5700_v52 = vunpack.c.h.bf16 %v5698_v58 }
 0x4ba   : > { %v3770_v20 = vpop.f32.mrf.mxu0 }
 0x4bb   : > { %v1755_v45 = vpack.c.bf16 %v3769_v48, %v3766_v6 }
 0x4bc   : > { %v3771_v46 = vpop.f32.mrf.mxu0 }
 0x4bd   : > { %4129 = vmatprep.mubr.bf16.mxu1 %v1755_v45  ;;  %v3772_v54 = vadd.f32 %v3771_v46, %v3770_v20 }
 0x4be   : > { %v3773_v51 = vpop.f32.mrf.mxu0 }
 0x4c0   : > { %v3774_v50 = vpop.f32.mrf.mxu0 }
 0x4c1   : > { %v3775_v22 = vadd.f32 %v3774_v50, %v3773_v51 }
 0x4c2   : > { %v3776_v38 = vpop.f32.mrf.mxu0 }
 0x4c3   : > { %v1756_v0 = vpack.c.bf16 %v3775_v22, %v3772_v54 }
 0x4c4   : > { %v3777_v36 = vpop.f32.mrf.mxu0 }
 0x4c5   : > { %4130 = vmatmul.mubr.bf16.gmra.mxu1 %v1756_v0  ;;  %v3778_v2 = vadd.f32 %v3777_v36, %v3776_v38  ;;  %v5701_v36 = vld [vmem:[#allocation13_spill] sm:$0xff] }
 0x4c6   : > { %v3779_v53 = vpop.f32.mrf.mxu0 }
 0x4c8   : > { %v3780_v18 = vpop.f32.mrf.mxu0 }
 0x4c9   : > { %v3781_v14 = vadd.f32 %v3780_v18, %v3779_v53 }
 0x4ca   : > { %v3782_v19 = vpop.f32.mrf.mxu0 }
 0x4cb   : > { %v1757_v27 = vpack.c.bf16 %v3781_v14, %v3778_v2  ;;  %v5703_v14 = vunpack.c.h.bf16 %v5701_v36 }
 0x4cc   : > { %v3783_v55 = vpop.f32.mrf.mxu0 }
 0x4cd   : > { %4133 = vmatprep.mubr.bf16.mxu1 %v1757_v27  ;;  %v3784_v28 = vadd.f32 %v3783_v55, %v3782_v19 }
 0x4ce   : > { %v3785_v34 = vpop.f32.mrf.mxu0 }
 0x4d0   : > { %v3786_v25 = vpop.f32.mrf.mxu0 }
 0x4d1   : > { %v3787_v30 = vadd.f32 %v3786_v25, %v3785_v34  ;;  %v4349_v34 = vld [vmem:[%s4693_s16 + $0x4] ss:$8 sps:$4 sm:$0xff]  }
 0x4d3   : > { %v1758_v31 = vpack.c.bf16 %v3787_v30, %v3784_v28 }
 0x4d5   : > { %4134 = vmatmul.mubr.bf16.gmra.mxu1 %v1758_v31 }
 0x4d6   : > { %2224 = vmatprep.mubr.bf16.mxu1 %v4349_v34  ;;  %v5709_v34 = vunpack.c.l.bf16 %v4780_v57 }
 0x525   : > { %v4107_v32 = vpop.f32.mrf.mxu1 }
 0x526   : > { %v1922_v60 = vadd.f32 %v4107_v32, %v5699_v62 }
 0x527   : > { %v1793_v33 = vpop.f32.mrf.mxu1 }
 0x528   : > { %v1920_v47 = vadd.f32 %v1793_v33, %v1470_v56  ;;  %v1954_v20 = vmax.f32 %v1922_v60, 0.0  ;;  %v5702_v56 = vunpack.c.l.bf16 %v5701_v36 }
 0x529   : > { %v4108_v11 = vpop.f32.mrf.mxu1 }
 0x52a   : > { %v1923_v6 = vadd.f32 %v4108_v11, %v5700_v52  ;;  %v1952_v51 = vmax.f32 %v1920_v47, 0.0 }
 0x52b   : > { %v1796_v48 = vpop.f32.mrf.mxu1 }
 0x52c   : > { %v1955_v45 = vmax.f32 %v1923_v6, 0.0  ;;  %v1921_v46 = vadd.f32 %v1796_v48, %v1471_v49 }
 0x52e   : > { %v5167_v50 = vpack.c.bf16 %v1955_v45, %v1954_v20  ;;  %v1953_v54 = vmax.f32 %v1921_v46, 0.0 }
 0x530   : > { %v5169_v22 = vpack.c.bf16 %v1953_v54, %v1952_v51 }
 0x535   : > { %v4111_v38 = vpop.f32.mrf.mxu1 }
 0x536   : > { %v1926_v53 = vadd.f32 %v4111_v38, %v5702_v56  ;;  %v5704_v56 = vld [vmem:[#allocation14_spill] sm:$0xff] }
 0x537   : > { %v1809_v0 = vpop.f32.mrf.mxu1 }
 0x538   : > { %v1924_v2 = vadd.f32 %v1809_v0, %v1474_v16  ;;  %v1958_v49 = vmax.f32 %v1926_v53, 0.0  ;;  %v5705_v53 = vunpack.c.h.bf16 %v5704_v56 }
 0x539   : > { %v4112_v18 = vpop.f32.mrf.mxu1 }
 0x53a   : > { %v1927_v17 = vadd.f32 %v4112_v18, %v5703_v14  ;;  %v1956_v25 = vmax.f32 %v1924_v2, 0.0  ;;  %v5706_v14 = vld [vmem:[#allocation15_spill] sm:$0xff] }
 0x53b   : > { %v1812_v19 = vpop.f32.mrf.mxu1 }
 0x53c   : > { %v1959_v27 = vmax.f32 %v1927_v17, 0.0  ;;  %v1925_v55 = vadd.f32 %v1812_v19, %v1475_v13  ;;  %v5707_v17 = vunpack.c.l.bf16 %v5706_v14 }
 0x53e   : > { %v5180_v28 = vpack.c.bf16 %v1959_v27, %v1958_v49  ;;  %v1957_v30 = vmax.f32 %v1925_v55, 0.0  ;;  %v5708_v49 = vunpack.c.l.bf16 %v5704_v56  ;;  %v5712_v56 = vunpack.c.h.bf16 %v4780_v57 }
 0x540   : > { %v5182_v31 = vpack.c.bf16 %v1957_v30, %v1956_v25  ;;  %v5710_v30 = vunpack.c.h.bf16 %v5706_v14 }
 0x545   : > { %v4115_v32 = vpop.f32.mrf.mxu1 }
 0x547   : > { %v1825_v33 = vpop.f32.mrf.mxu1 }
 0x548   : > { %v1928_v63 = vadd.f32 %v1825_v33, %v1478_v37 }
 0x549   : > { %v4116_v16 = vpop.f32.mrf.mxu1 }
 0x54b   : > { %v1828_v58 = vpop.f32.mrf.mxu1 }
 0x555   : > { %v4119_v62 = vpop.f32.mrf.mxu1 }
 0x556   : > { %v1934_v27 = vadd.f32 %v4119_v62, %v5708_v49  ;;  %v5713_v49 = vunpack.c.l.bf16 %v4784_v59  ;;  %v1930_v59 = vadd.f32 %v4115_v32, %v1480_v24 }
 0x557   : > { %v1841_v60 = vpop.f32.mrf.mxu1 }
 0x559   : > { %v4120_v11 = vpop.f32.mrf.mxu1 }
 0x55a   : > { %v1935_v18 = vadd.f32 %v4120_v11, %v5705_v53 }
 0x55b   : > { %v1844_v47 = vpop.f32.mrf.mxu1 }
 0x55c   : > { %v1967_v9 = vmax.f32 %v1935_v18, 0.0  ;;  %v1933_v4 = vadd.f32 %v1844_v47, %v5711_v43  ;;  %v1931_v43 = vadd.f32 %v4116_v16, %v1481_v40  ;;  %v1929_v40 = vadd.f32 %v1828_v58, %v1479_v35 }
 0x55e   : > { %v1961_v32 = vmax.f32 %v1929_v40, 0.0  ;;  %v4377_v40 = vld [vmem:[%s4693_s16 + $0xa0] ss:$8 sps:$4 sm:$0xff]  }
 0x565   : > { %v5184_v52 = vpop.f32.mrf.mxu1 }
 0x567   : > { %v5186_v10 = vpop.f32.mrf.mxu1 }
 0x569   : > { %v5188_v13 = vpop.f32.mrf.mxu1 }
 0x56b   : > { %v5190_v6 = vpop.f32.mrf.mxu1 }
 0x575   : > { %v4127_v48 = vpop.f32.mrf.mxu1 }
 0x576   : > { %v1942_v1 = vadd.f32 %v4127_v48, %v1492_v41  ;;  %v1939_v41 = vadd.f32 %v5188_v13, %v5715_v5  ;;  %v5718_v13 = vunpack.c.l.bf16 %v4824_v15 }
 0x577   : > { %v1873_v20 = vpop.f32.mrf.mxu1 }
 0x579   : > { %v4128_v45 = vpop.f32.mrf.mxu1 }
 0x57b   : > { %v1876_v46 = vpop.f32.mrf.mxu1 }
 0x57c   : > { %v1941_v35 = vadd.f32 %v1876_v46, %v1491_v21 }
 0x57e   : > { %v1973_v48 = vmax.f32 %v1941_v35, 0.0 }
 0x585   : > { %v4131_v51 = vpop.f32.mrf.mxu1 }
 0x586   : > { %v1946_v14 = vadd.f32 %v4131_v51, %v1496_v26  ;;  %v1962_v51 = vmax.f32 %v1930_v59, 0.0  ;;  %v4399_v59 = vld [vmem:[%s5575_s9 + $0x18] sm:$0xff]  }
 0x587   : > { %v1889_v54 = vpop.f32.mrf.mxu1 }
 0x588   : > { %v1978_v61 = vmax.f32 %v1946_v14, 0.0  ;;  %v1944_v26 = vadd.f32 %v1889_v54, %v1494_v42  ;;  %v4359_v14 = vld [vmem:[%s4693_s16 + $0x40] ss:$8 sps:$4 sm:$0xff]  }
 0x589   : > { %v4132_v38 = vpop.f32.mrf.mxu1 }
 0x58a   : > { %v1947_v11 = vadd.f32 %v4132_v38, %v1497_v39  ;;  %v1965_v39 = vmax.f32 %v1933_v4, 0.0  ;;  %v1976_v24 = vmax.f32 %v1944_v26, 0.0  ;;  %v4400_v26 = vld [vmem:[%s5575_s9 + $0x10] sm:$0xff]  }
 0x58b   : > { %v1892_v0 = vpop.f32.mrf.mxu1 }
 0x58c   : > { %v1979_v38 = vmax.f32 %v1947_v11, 0.0  ;;  %v1945_v57 = vadd.f32 %v1892_v0, %v1495_v44  ;;  %v1943_v44 = vadd.f32 %v4128_v45, %v1493_v23  ;;  %v1960_v23 = vmax.f32 %v1928_v63, 0.0  ;;  %v4388_v63 = vld [vmem:[%s4693_s16 + $0xd4] ss:$8 sps:$4 sm:$0xff]  }
 0x58d   : > { %v1974_v45 = vmax.f32 %v1942_v1, 0.0  ;;  %v5714_v0 = vunpack.c.l.bf16 %v4810_v8  ;;  %v1936_v11 = vadd.f32 %v5186_v10, %v5718_v13  ;;  %v4350_v10 = vld [vmem:[%s4693_s16 + $0x14] ss:$8 sps:$4 sm:$0xff]   ;;  %v4386_v1 = vld [vmem:[%s4693_s16 + $0xd0] ss:$8 sps:$4 sm:$0xff]  }
 0x58e   : > { %v1977_v16 = vmax.f32 %v1945_v57, 0.0  ;;  %v1975_v54 = vmax.f32 %v1943_v44, 0.0  ;;  %v1988_v37 = vpack.c.bf16 %v1961_v32, %v1960_v23  ;;  %v4371_v57 = vld [vmem:[%s4693_s16 + $0x80] ss:$8 sps:$4 sm:$0xff]   ;;  %v4394_v32 = vld [vmem:[%s4693_s16 + $0xf4] ss:$8 sps:$4 sm:$0xff]  }
 0x58f   : > { %v1940_v3 = vadd.f32 %v1873_v20, %v5714_v0  ;;  %v4402_v44 = vld [vmem:[%s5575_s9] sm:$0xff]  }
 0x590   : > { %v1996_v58 = vpack.c.bf16 %v1977_v16, %v1976_v24  ;;  %v1995_v33 = vpack.c.bf16 %v1975_v54, %v1974_v45  ;;  %v4385_v16 = vld [vmem:[%s4693_s16 + $0xc4] ss:$8 sps:$4 sm:$0xff]   ;;  %v4392_v54 = vld [vmem:[%s4693_s16 + $0xf0] ss:$8 sps:$4 sm:$0xff]  }
 0x591   : > { %v1972_v46 = vmax.f32 %v1940_v3, 0.0  ;;  %v4391_v24 = vld [vmem:[%s4693_s16 + $0xe4] ss:$8 sps:$4 sm:$0xff]  }
 0x592   : > { %v4403_v23 = vld [vmem:[%s5574_s8] sm:$0xff]  }
 0x593   : > { %v1994_v20 = vpack.c.bf16 %v1973_v48, %v1972_v46 }
 0x595   : > { %v4135_v36 = vpop.f32.mrf.mxu1 }
 0x596   : > { %v1950_v19 = vadd.f32 %v4135_v36, %v5707_v17  ;;  %v1966_v17 = vmax.f32 %v1934_v27, 0.0  ;;  %v1971_v27 = vmax.f32 %v1939_v41, 0.0 }
 0x597   : > { %v1905_v2 = vpop.f32.mrf.mxu1 }
 0x598   : > { %v1948_v25 = vadd.f32 %v1905_v2, %v5709_v34  ;;  %v1982_v53 = vmax.f32 %v1950_v19, 0.0  ;;  %v1932_v2 = vadd.f32 %v1841_v60, %v5713_v49  ;;  %v1991_v47 = vpack.c.bf16 %v1967_v9, %v1966_v17  ;;  %v4356_v17 = vld [vmem:[%s4693_s16 + $0x34] ss:$8 sps:$4 sm:$0xff]   ;;  %v4358_v49 = vld [vmem:[%s4693_s16 + $0x30] ss:$8 sps:$4 sm:$0xff]  }
 0x599   : > { %v4136_v55 = vpop.f32.mrf.mxu1  ;;  %v1963_v60 = vmax.f32 %v1931_v43, 0.0  ;;  %v1997_v9 = vpack.c.bf16 %v1979_v38, %v1978_v61  ;;  %v5716_v19 = vunpack.c.l.bf16 %v4818_v12  ;;  %v4365_v43 = vld [vmem:[%s4693_s16 + $0x60] ss:$8 sps:$4 sm:$0xff]   ;;  %v4373_v38 = vld [vmem:[%s4693_s16 + $0x84] ss:$8 sps:$4 sm:$0xff]  }
 0x59a   : > { %v1951_v29 = vadd.f32 %v4136_v55, %v5710_v30  ;;  %v1980_v18 = vmax.f32 %v1948_v25, 0.0  ;;  %v5717_v25 = vunpack.c.h.bf16 %v4824_v15  ;;  %v4347_v15 = vld [vmem:[%s4693_s16] ss:$8 sps:$4 sm:$0xff]   ;;  %v4379_v61 = vld [vmem:[%s4693_s16 + $0xa4] ss:$8 sps:$4 sm:$0xff]  }
 0x59b   : > { %v1908_v7 = vpop.f32.mrf.mxu1  ;;  %v1989_v42 = vpack.c.bf16 %v1963_v60, %v1962_v51  ;;  %v1938_v21 = vadd.f32 %v5184_v52, %v5716_v19  ;;  %v4401_v60 = vld [vmem:[%s5575_s9 + $0x8] sm:$0xff]  }
 0x59c   : > { %v1983_v36 = vmax.f32 %v1951_v29, 0.0  ;;  %v1949_v62 = vadd.f32 %v1908_v7, %v5712_v56  ;;  %v1964_v29 = vmax.f32 %v1932_v2, 0.0  ;;  %v1937_v8 = vadd.f32 %v5190_v6, %v5717_v25  ;;  %v4395_v6 = vld [vmem:[%s5575_s9 + $0x38] sm:$0xff]   ;;  %v4361_v2 = vld [vmem:[%s4693_s16 + $0x44] ss:$8 sps:$4 sm:$0xff]  }
 0x59d   : > { %v1970_v30 = vmax.f32 %v1938_v21, 0.0  ;;  %4137 = vmatprep.subr.bf16.mxu0 %v4395_v6  ;;  %v4352_v56 = vld [vmem:[%s4693_s16 + $0x10] ss:$8 sps:$4 sm:$0xff]   ;;  %v4383_v51 = vld [vmem:[%s4693_s16 + $0xc0] ss:$8 sps:$4 sm:$0xff]  }
 0x59e   : > { %v1999_v55 = vpack.c.bf16 %v1983_v36, %v1982_v53  ;;  %v1981_v34 = vmax.f32 %v1949_v62, 0.0  ;;  %v1990_v4 = vpack.c.bf16 %v1965_v39, %v1964_v29  ;;  %v1969_v52 = vmax.f32 %v1937_v8, 0.0  ;;  %4138 = vmatpush3.bf16.msra.mxu0 %v4395_v6  ;;  %v4353_v62 = vld [vmem:[%s4693_s16 + $0x24] ss:$8 sps:$4 sm:$0xff]   ;;  %v4368_v39 = vld [vmem:[%s4693_s16 + $0x70] ss:$8 sps:$4 sm:$0xff]  }
 0x59f   : > { %v1993_v12 = vpack.c.bf16 %v1971_v27, %v1970_v30  ;;  %v1968_v53 = vmax.f32 %v1936_v11, 0.0  ;;  %v4374_v29 = vld [vmem:[%s4693_s16 + $0x90] ss:$8 sps:$4 sm:$0xff]  }
 0x5a0   : > { %v1998_v7 = vpack.c.bf16 %v1981_v34, %v1980_v18  ;;  %3812 = vmatprep.subr.bf16.mxu1 %v1999_v55  ;;  %v4364_v18 = vld [vmem:[%s4693_s16 + $0x54] ss:$8 sps:$4 sm:$0xff]   ;;  %v4362_v55 = vld [vmem:[%s4693_s16 + $0x50] ss:$8 sps:$4 sm:$0xff]   ;;  %v4367_v34 = vld [vmem:[%s4693_s16 + $0x64] ss:$8 sps:$4 sm:$0xff]  }
 0x5a1   : > { %3813 = vmatpush3.bf16.msra.mxu1 %v1991_v47  ;;  %v1992_v36 = vpack.c.bf16 %v1969_v52, %v1968_v53  ;;  %v4370_v47 = vld [vmem:[%s4693_s16 + $0x74] ss:$8 sps:$4 sm:$0xff]  }
 0x5a2   : > { %3814 = vmatprep.subr.bf16.mxu1 %v1998_v7  ;;  %v4376_v7 = vld [vmem:[%s4693_s16 + $0x94] ss:$8 sps:$4 sm:$0xff]  }
 0x5a5   : > { %3815 = vmatpush3.bf16.msra.mxu1 %v1990_v4  ;;  %v4382_v4 = vld [vmem:[%s4693_s16 + $0xb4] ss:$8 sps:$4 sm:$0xff]  }
 0x5a6   : > { %3816 = vmatprep.subr.bf16.mxu1 %v1997_v9  ;;  %v4380_v9 = vld [vmem:[%s4693_s16 + $0xb0] ss:$8 sps:$4 sm:$0xff]  }
 0x5a9   : > { %3817 = vmatpush3.bf16.msra.mxu1 %v1989_v42  ;;  %v4389_v42 = vld [vmem:[%s4693_s16 + $0xe0] ss:$8 sps:$4 sm:$0xff]  }
 0x5aa   : > { %3818 = vmatprep.subr.bf16.mxu1 %v1996_v58 }
 0x5ad   : > { %3819 = vmatpush3.bf16.msra.mxu1 %v1988_v37 }
 0x5ae   : > { %3820 = vmatprep.subr.bf16.mxu1 %v1995_v33 }
 0x5b1   : > { %3821 = vmatpush3.bf16.msra.mxu1 %v5180_v28  ;;  %v4396_v28 = vld [vmem:[%s5575_s9 + $0x30] sm:$0xff]  }
 0x5b2   : > { %3822 = vmatprep.subr.bf16.mxu1 %v1994_v20  ;;  %4139 = vmatprep.subr.bf16.mxu0 %v4396_v28 }
 0x5b3   : > { %4140 = vmatpush3.bf16.msra.mxu0 %v4396_v28 }
 0x5b5   : > { %3823 = vmatpush3.bf16.msra.mxu1 %v5182_v31  ;;  %v4397_v31 = vld [vmem:[%s5575_s9 + $0x28] sm:$0xff]  }
 0x5b6   : > { %3824 = vmatprep.subr.bf16.mxu1 %v1993_v12  ;;  %4141 = vmatprep.subr.bf16.mxu0 %v4397_v31 }
 0x5b7   : > { %4142 = vmatpush3.bf16.msra.mxu0 %v4397_v31 }
 0x5b9   : > { %3825 = vmatpush3.bf16.msra.mxu1 %v5167_v50  ;;  %v4398_v50 = vld [vmem:[%s5575_s9 + $0x20] sm:$0xff]  }
 0x5ba   : > { %3826 = vmatprep.subr.bf16.mxu1 %v1992_v36  ;;  %4143 = vmatprep.subr.bf16.mxu0 %v4398_v50 }
 0x5bb   : > { %4144 = vmatpush3.bf16.msra.mxu0 %v4398_v50 }
 0x5bc   : > { %4145 = vmatprep.subr.bf16.mxu0 %v4399_v59 }
 0x5bd   : > { %3827 = vmatpush3.bf16.msra.mxu1 %v5169_v22  ;;  %v4355_v22 = vld [vmem:[%s4693_s16 + $0x20] ss:$8 sps:$4 sm:$0xff]   ;;  %s3519_s16 = sshll.u32 %s4701_s19, 6  ;;  %s4460_s19 = scalar_lea.vmem %s5517_s23, 1024 }
 0x5be   : > { %s5378_s26 = scalar_lea.vmem %s5570_s4, %s3519_s16  ;;  %s504_s24 = scalar_lea.vmem %s5571_s5, %s3519_s16 }
 0x5bf   : > { %4146 = vmatpush3.bf16.msra.mxu0 %v4399_v59  ;;  %p4461_p11 = scmp.ne.s32.totalorder %s5517_s23, %s4460_s19 }
 0x5c0   : > { %2225 = vmatmul.mubr.bf16.vlgmr.msra.gmra.mxu1 %v4347_v15  ;;  %4147 = vmatprep.subr.bf16.mxu0 %v4400_v26 }
 0x5c1   : > { %2232 = vmatprep.mubr.bf16.mxu1 %v4350_v10  ;;  %p4462_p4 = pnand %p4461_p11, %p5719_p12 }
 0x5c3   : > { %4148 = vmatpush3.bf16.msra.mxu0 %v4400_v26  ;;  %p4463_p5 = pneg %p4462_p4 }
 0x5c4   : > { %4149 = vmatprep.subr.bf16.mxu0 %v4401_v60 }
 0x5c7   : > { %4150 = vmatpush3.bf16.msra.mxu0 %v4401_v60 }
 0x5c8   : > { %2233 = vmatmul.mubr.bf16.gmra.mxu1 %v4352_v56  ;;  %4151 = vmatprep.subr.bf16.mxu0 %v4402_v44 }
 0x5c9   : > { %2240 = vmatprep.mubr.bf16.mxu1 %v4353_v62 }
 0x5cb   : > { %4152 = vmatpush3.bf16.msra.mxu0 %v4402_v44 }
 0x5cc   : > { %4185 = vmatprep.subr.bf16.mxu0 %v4403_v23 }
 0x5d0   : > { %2241 = vmatmul.mubr.bf16.gmra.mxu1 %v4355_v22 }
 0x5d1   : > { %2248 = vmatprep.mubr.bf16.mxu1 %v4356_v17 }
 0x5d8   : > { %2249 = vmatmul.mubr.bf16.gmra.mxu1 %v4358_v49 }
 0x5d9   : > { %2256 = vmatprep.mubr.bf16.mxu1 %v4361_v2 }
 0x5e0   : > { %2257 = vmatmul.mubr.bf16.gmra.mxu1 %v4359_v14 }
 0x5e1   : > { %2264 = vmatprep.mubr.bf16.mxu1 %v4364_v18 }
 0x5e8   : > { %2265 = vmatmul.mubr.bf16.gmra.mxu1 %v4362_v55 }
 0x5e9   : > { %2272 = vmatprep.mubr.bf16.mxu1 %v4367_v34 }
 0x5f0   : > { %2273 = vmatmul.mubr.bf16.gmra.mxu1 %v4365_v43 }
 0x5f1   : > { %2280 = vmatprep.mubr.bf16.mxu1 %v4370_v47 }
 0x5f8   : > { %2281 = vmatmul.mubr.bf16.gmra.mxu1 %v4368_v39 }
 0x5f9   : > { %2288 = vmatprep.mubr.bf16.mxu1 %v4373_v38 }
 0x600   : > { %2289 = vmatmul.mubr.bf16.gmra.mxu1 %v4371_v57 }
 0x601   : > { %2296 = vmatprep.mubr.bf16.mxu1 %v4376_v7 }
 0x608   : > { %2297 = vmatmul.mubr.bf16.gmra.mxu1 %v4374_v29 }
 0x609   : > { %2304 = vmatprep.mubr.bf16.mxu1 %v4379_v61 }
 0x610   : > { %2305 = vmatmul.mubr.bf16.gmra.mxu1 %v4377_v40 }
 0x611   : > { %2312 = vmatprep.mubr.bf16.mxu1 %v4382_v4 }
 0x618   : > { %2313 = vmatmul.mubr.bf16.gmra.mxu1 %v4380_v9 }
 0x619   : > { %2320 = vmatprep.mubr.bf16.mxu1 %v4385_v16 }
 0x620   : > { %2321 = vmatmul.mubr.bf16.gmra.mxu1 %v4383_v51 }
 0x621   : > { %2328 = vmatprep.mubr.bf16.mxu1 %v4388_v63 }
 0x628   : > { %2329 = vmatmul.mubr.bf16.gmra.mxu1 %v4386_v1 }
 0x629   : > { %2336 = vmatprep.mubr.bf16.mxu1 %v4391_v24 }
 0x630   : > { %2337 = vmatmul.mubr.bf16.gmra.mxu1 %v4389_v42 }
 0x631   : > { %2344 = vmatprep.mubr.bf16.mxu1 %v4394_v32 }
 0x638   : > { %2345 = vmatmul.mubr.bf16.gmra.mxu1 %v4392_v54 }
 0x680   : > { %v3828_v35 = vpop.f32.mrf.mxu1 }
 0x682   : > { %v3829_v58 = vpop.f32.mrf.mxu1 }
 0x683   : > { %v3830_v3 = vadd.f32 %v3829_v58, %v3828_v35 }
 0x684   : > { %v3831_v45 = vpop.f32.mrf.mxu1 }
 0x686   : > { %v3832_v0 = vpop.f32.mrf.mxu1 }
 0x687   : > { %v3833_v37 = vadd.f32 %v3832_v0, %v3831_v45 }
 0x688   : > { %v3834_v5 = vpop.f32.mrf.mxu1 }
 0x689   : > { %v2387_v41 = vpack.c.bf16 %v3833_v37, %v3830_v3 }
 0x68a   : > { %v3835_v33 = vpop.f32.mrf.mxu1 }
 0x68b   : > { %4153 = vmatprep.mubr.bf16.mxu0 %v2387_v41  ;;  %v3836_v21 = vadd.f32 %v3835_v33, %v3834_v5 }
 0x68c   : > { %v3837_v48 = vpop.f32.mrf.mxu1 }
 0x68e   : > { %v3838_v19 = vpop.f32.mrf.mxu1 }
 0x68f   : > { %v3839_v46 = vadd.f32 %v3838_v19, %v3837_v48 }
 0x690   : > { %v3840_v27 = vpop.f32.mrf.mxu1 }
 0x691   : > { %v2388_v25 = vpack.c.bf16 %v3839_v46, %v3836_v21 }
 0x692   : > { %v3841_v8 = vpop.f32.mrf.mxu1 }
 0x693   : > { %4154 = vmatmul.mubr.bf16.vlgmr.msra.gmra.mxu0 %v2388_v25  ;;  %v3842_v13 = vadd.f32 %v3841_v8, %v3840_v27 }
 0x694   : > { %v3843_v20 = vpop.f32.mrf.mxu1  ;;  %4186 = vmatpush3.bf16.msra.mxu0 %v4403_v23 }
 0x696   : > { %v3844_v30 = vpop.f32.mrf.mxu1 }
 0x697   : > { %v3845_v11 = vadd.f32 %v3844_v30, %v3843_v20 }
 0x698   : > { %v3846_v12 = vpop.f32.mrf.mxu1 }
 0x699   : > { %v2389_v52 = vpack.c.bf16 %v3845_v11, %v3842_v13 }
 0x69a   : > { %v3847_v53 = vpop.f32.mrf.mxu1 }
 0x69b   : > { %4157 = vmatprep.mubr.bf16.mxu0 %v2389_v52  ;;  %v3848_v28 = vadd.f32 %v3847_v53, %v3846_v12 }
 0x69c   : > { %v3849_v36 = vpop.f32.mrf.mxu1 }
 0x69e   : > { %v3850_v6 = vpop.f32.mrf.mxu1 }
 0x69f   : > { %v3851_v15 = vadd.f32 %v3850_v6, %v3849_v36 }
 0x6a0   : > { %v3852_v31 = vpop.f32.mrf.mxu1 }
 0x6a1   : > { %v2390_v10 = vpack.c.bf16 %v3851_v15, %v3848_v28 }
 0x6a2   : > { %v3853_v50 = vpop.f32.mrf.mxu1 }
 0x6a3   : > { %4158 = vmatmul.mubr.bf16.gmra.mxu0 %v2390_v10  ;;  %v3854_v22 = vadd.f32 %v3853_v50, %v3852_v31 }
 0x6a4   : > { %v3855_v56 = vpop.f32.mrf.mxu1 }
 0x6a6   : > { %v3856_v62 = vpop.f32.mrf.mxu1 }
 0x6a7   : > { %v3857_v17 = vadd.f32 %v3856_v62, %v3855_v56 }
 0x6a8   : > { %v3858_v49 = vpop.f32.mrf.mxu1 }
 0x6a9   : > { %v2391_v2 = vpack.c.bf16 %v3857_v17, %v3854_v22 }
 0x6aa   : > { %v3859_v14 = vpop.f32.mrf.mxu1 }
 0x6ab   : > { %4161 = vmatprep.mubr.bf16.mxu0 %v2391_v2  ;;  %v3860_v34 = vadd.f32 %v3859_v14, %v3858_v49 }
 0x6ac   : > { %v3861_v18 = vpop.f32.mrf.mxu1 }
 0x6ae   : > { %v3862_v55 = vpop.f32.mrf.mxu1 }
 0x6af   : > { %v3863_v43 = vadd.f32 %v3862_v55, %v3861_v18 }
 0x6b0   : > { %v3864_v47 = vpop.f32.mrf.mxu1 }
 0x6b1   : > { %v2392_v39 = vpack.c.bf16 %v3863_v43, %v3860_v34 }
 0x6b2   : > { %v3865_v38 = vpop.f32.mrf.mxu1 }
 0x6b3   : > { %4162 = vmatmul.mubr.bf16.gmra.mxu0 %v2392_v39  ;;  %v3866_v59 = vadd.f32 %v3865_v38, %v3864_v47 }
 0x6b4   : > { %v3867_v57 = vpop.f32.mrf.mxu1 }
 0x6b6   : > { %v3868_v7 = vpop.f32.mrf.mxu1 }
 0x6b7   : > { %v3869_v29 = vadd.f32 %v3868_v7, %v3867_v57 }
 0x6b8   : > { %v3870_v61 = vpop.f32.mrf.mxu1 }
 0x6b9   : > { %v2393_v26 = vpack.c.bf16 %v3869_v29, %v3866_v59  ;;  %v4404_v29 = vld [vmem:[%s4742_s27] sm:$0xff]  }
 0x6ba   : > { %v3871_v60 = vpop.f32.mrf.mxu1 }
 0x6bb   : > { %4165 = vmatprep.mubr.bf16.mxu0 %v2393_v26  ;;  %v3872_v44 = vadd.f32 %v3871_v60, %v3870_v61  ;;  %v4405_v26 = vld [vmem:[%s4742_s27 + $0x8] sm:$0xff]   ;;  %v4406_v60 = vld [vmem:[%s4742_s27 + $0x10] sm:$0xff]  }
 0x6bc   : > { %v3873_v40 = vpop.f32.mrf.mxu1 }
 0x6be   : > { %v3874_v4 = vpop.f32.mrf.mxu1 }
 0x6bf   : > { %v3875_v9 = vadd.f32 %v3874_v4, %v3873_v40  ;;  %v4407_v40 = vld [vmem:[%s4742_s27 + $0x18] sm:$0xff]   ;;  %v4408_v4 = vld [vmem:[%s4742_s27 + $0x20] sm:$0xff]  }
 0x6c0   : > { %v3876_v16 = vpop.f32.mrf.mxu1 }
 0x6c1   : > { %v2394_v51 = vpack.c.bf16 %v3875_v9, %v3872_v44  ;;  %v4409_v44 = vld [vmem:[%s4742_s27 + $0x28] sm:$0xff]   ;;  %v4410_v9 = vld [vmem:[%s4742_s27 + $0x30] sm:$0xff]  }
 0x6c2   : > { %v3877_v63 = vpop.f32.mrf.mxu1 }
 0x6c3   : > { %4166 = vmatmul.mubr.bf16.gmra.mxu0 %v2394_v51  ;;  %v3878_v42 = vadd.f32 %v3877_v63, %v3876_v16  ;;  %v4411_v16 = vld [vmem:[%s4742_s27 + $0x38] sm:$0xff]   ;;  %v4412_v51 = vld [vmem:[%s4742_s27 + $0x40] sm:$0xff]   ;;  %v4413_v63 = vld [vmem:[%s4742_s27 + $0x48] sm:$0xff]  }
 0x6c4   : > { %v3879_v1 = vpop.f32.mrf.mxu1 }
 0x6c6   : > { %v3880_v24 = vpop.f32.mrf.mxu1 }
 0x6c7   : > { %v3881_v32 = vadd.f32 %v3880_v24, %v3879_v1  ;;  %v4414_v1 = vld [vmem:[%s4742_s27 + $0x50] sm:$0xff]   ;;  %v4415_v24 = vld [vmem:[%s4742_s27 + $0x58] sm:$0xff]  }
 0x6c8   : > { %v3882_v54 = vpop.f32.mrf.mxu1 }
 0x6c9   : > { %v2395_v35 = vpack.c.bf16 %v3881_v32, %v3878_v42  ;;  %v4416_v42 = vld [vmem:[%s4742_s27 + $0x60] sm:$0xff]   ;;  %v4417_v32 = vld [vmem:[%s4742_s27 + $0x68] sm:$0xff]  }
 0x6ca   : > { %v3883_v58 = vpop.f32.mrf.mxu1 }
 0x6cb   : > { %4169 = vmatprep.mubr.bf16.mxu0 %v2395_v35  ;;  %v3884_v0 = vadd.f32 %v3883_v58, %v3882_v54  ;;  %v4418_v54 = vld [vmem:[%s4742_s27 + $0x70] sm:$0xff]   ;;  %v4419_v35 = vld [vmem:[%s4742_s27 + $0x78] sm:$0xff]  }
 0x6cc   : > { %v3885_v23 = vpop.f32.mrf.mxu1 }
 0x6ce   : > { %v3886_v45 = vpop.f32.mrf.mxu1 }
 0x6cf   : > { %v3887_v3 = vadd.f32 %v3886_v45, %v3885_v23 }
 0x6d0   : > { %v3888_v37 = vpop.f32.mrf.mxu1 }
 0x6d1   : > { %v2396_v5 = vpack.c.bf16 %v3887_v3, %v3884_v0 }
 0x6d2   : > { %v3889_v41 = vpop.f32.mrf.mxu1 }
 0x6d3   : > { %4170 = vmatmul.mubr.bf16.gmra.mxu0 %v2396_v5  ;;  %v3890_v19 = vadd.f32 %v3889_v41, %v3888_v37 }
 0x6d4   : > { %v3891_v33 = vpop.f32.mrf.mxu1 }
 0x6d6   : > { %v3892_v48 = vpop.f32.mrf.mxu1 }
 0x6d7   : > { %v3893_v21 = vadd.f32 %v3892_v48, %v3891_v33 }
 0x6d8   : > { %v3894_v46 = vpop.f32.mrf.mxu1 }
 0x6d9   : > { %v2397_v27 = vpack.c.bf16 %v3893_v21, %v3890_v19 }
 0x6da   : > { %v3895_v25 = vpop.f32.mrf.mxu1 }
 0x6db   : > { %4173 = vmatprep.mubr.bf16.mxu0 %v2397_v27  ;;  %v3896_v30 = vadd.f32 %v3895_v25, %v3894_v46 }
 0x6dc   : > { %v3897_v8 = vpop.f32.mrf.mxu1 }
 0x6de   : > { %v3898_v20 = vpop.f32.mrf.mxu1 }
 0x6df   : > { %v3899_v13 = vadd.f32 %v3898_v20, %v3897_v8 }
 0x6e0   : > { %v3900_v11 = vpop.f32.mrf.mxu1 }
 0x6e1   : > { %v2398_v12 = vpack.c.bf16 %v3899_v13, %v3896_v30 }
 0x6e2   : > { %v3901_v52 = vpop.f32.mrf.mxu1 }
 0x6e3   : > { %4174 = vmatmul.mubr.bf16.gmra.mxu0 %v2398_v12  ;;  %v3902_v6 = vadd.f32 %v3901_v52, %v3900_v11 }
 0x6e4   : > { %v3903_v53 = vpop.f32.mrf.mxu1 }
 0x6e6   : > { %v3904_v36 = vpop.f32.mrf.mxu1 }
 0x6e7   : > { %v3905_v28 = vadd.f32 %v3904_v36, %v3903_v53  ;;  %v4422_v53 = vld [vmem:[%s5378_s26 + $0x4] ss:$8 sps:$4 sm:$0xff]  }
 0x6e8   : > { %v3906_v15 = vpop.f32.mrf.mxu1  ;;  %3091 = vmatprep.mubr.bf16.mxu1 %v4422_v53 }
 0x6e9   : > { %v2399_v31 = vpack.c.bf16 %v3905_v28, %v3902_v6 }
 0x6ea   : > { %v3907_v10 = vpop.f32.mrf.mxu1 }
 0x6eb   : > { %4177 = vmatprep.mubr.bf16.mxu0 %v2399_v31  ;;  %v3908_v62 = vadd.f32 %v3907_v10, %v3906_v15 }
 0x6ec   : > { %v3909_v50 = vpop.f32.mrf.mxu1 }
 0x6ee   : > { %v3910_v56 = vpop.f32.mrf.mxu1 }
 0x6ef   : > { %v3911_v22 = vadd.f32 %v3910_v56, %v3909_v50 }
 0x6f0   : > { %v3912_v17 = vpop.f32.mrf.mxu1 }
 0x6f1   : > { %v2400_v49 = vpack.c.bf16 %v3911_v22, %v3908_v62 }
 0x6f2   : > { %v3913_v2 = vpop.f32.mrf.mxu1 }
 0x6f3   : > { %4178 = vmatmul.mubr.bf16.gmra.mxu0 %v2400_v49  ;;  %v3914_v55 = vadd.f32 %v3913_v2, %v3912_v17  ;;  %v3124_v17 = vld [vmem:[%s504_s24] sm:$0xff]  ;;  %v3126_v49 = vld [vmem:[%s504_s24 + $0x10] sm:$0xff] }
 0x6f4   : > { %v3915_v14 = vpop.f32.mrf.mxu1  ;;  %3134 = vperm.xlu0 %4271, %v3124_v17   ;;  %3144 = vperm.xlu1 %4272, %v3126_v49  }
 0x6f6   : > { %v3916_v18 = vpop.f32.mrf.mxu1 }
 0x6f7   : > { %v3917_v34 = vadd.f32 %v3916_v18, %v3915_v14  ;;  %v3125_v14 = vld [vmem:[%s504_s24 + $0x8] sm:$0xff]  ;;  %v3127_v18 = vld [vmem:[%s504_s24 + $0x18] sm:$0xff] }
 0x6f8   : > { %v3918_v43 = vpop.f32.mrf.mxu1  ;;  %3139 = vperm.xlu0 %4271, %v3125_v14   ;;  %3149 = vperm.xlu1 %4272, %v3127_v18  }
 0x6f9   : > { %v2401_v47 = vpack.c.bf16 %v3917_v34, %v3914_v55  ;;  %v5407_v34 = vld [vmem:[%s5576_s10] ss:$0 sm:$0xff] }
 0x6fa   : > { %v3919_v39 = vpop.f32.mrf.mxu1 }
 0x6fb   : > { %4181 = vmatprep.mubr.bf16.mxu0 %v2401_v47  ;;  %v3920_v7 = vadd.f32 %v3919_v39, %v3918_v43 }
 0x6fc   : > { %v3921_v38 = vpop.f32.mrf.mxu1 }
 0x6fe   : > { %v3922_v57 = vpop.f32.mrf.mxu1 }
 0x6ff   : > { %v3923_v59 = vadd.f32 %v3922_v57, %v3921_v38  ;;  %v3129_v38 = vld [vmem:[%s504_s24 + $0x28] sm:$0xff]  ;;  %v3128_v57 = vld [vmem:[%s504_s24 + $0x20] sm:$0xff] }
 0x700   : > { %3159 = vperm.xlu1 %4272, %v3129_v38   ;;  %3154 = vperm.xlu0 %4271, %v3128_v57  }
 0x701   : > { %v2402_v61 = vpack.c.bf16 %v3923_v59, %v3920_v7 }
 0x703   : > { %4182 = vmatmul.mubr.bf16.gmra.mxu0 %v2402_v61 }
 0x704   : > { %4187 = vmatprep.mubr.msk.bf16.mxu0 %vm2714_vm2, %v4404_v29 }
 0x70b   : > { %4188 = vmatmul.mubr.msk.bf16.vlgmr.msra.gmra.mxu0 %vm2714_vm2, %v4405_v26 }
 0x70c   : > { %4191 = vmatprep.mubr.msk.bf16.mxu0 %vm2714_vm2, %v4406_v60 }
 0x713   : > { %4192 = vmatmul.mubr.msk.bf16.gmra.mxu0 %vm2714_vm2, %v4407_v40 }
 0x714   : > { %4195 = vmatprep.mubr.msk.bf16.mxu0 %vm2714_vm2, %v4408_v4  ;;  %v3131_v4 = vld [vmem:[%s504_s24 + $0x38] sm:$0xff] }
 0x715   : > { %3169 = vperm.xlu1 %4272, %v3131_v4  }
 0x71b   : > { %4196 = vmatmul.mubr.msk.bf16.gmra.mxu0 %vm2714_vm2, %v4409_v44  ;;  %v3130_v44 = vld [vmem:[%s504_s24 + $0x30] sm:$0xff]  ;;  %s4466_s24 = scalar_lea.vmem %s4465_s22, 2048 }
 0x71c   : > { %4199 = vmatprep.mubr.msk.bf16.mxu0 %vm2714_vm2, %v4410_v9  ;;  %3164 = vperm.xlu0 %4271, %v3130_v44   ;;  %p4468_p8 = scmp.lt.s32.totalorder %s4466_s24, %s4460_s19 }
 0x71e   : > { %p4469_p9 = por %p4468_p8, %p4467_p7 }
 0x720   : > { %p4470_p13 = pnand %p4469_p9, %p4463_p5 }
 0x723   : > { %4200 = vmatmul.mubr.msk.bf16.gmra.mxu0 %vm2714_vm2, %v4411_v16 }
 0x724   : > { %4203 = vmatprep.mubr.msk.bf16.mxu0 %vm2714_vm2, %v4412_v51 }
 0x72b   : > { %4204 = vmatmul.mubr.msk.bf16.gmra.mxu0 %vm2714_vm2, %v4413_v63 }
 0x72c   : > { %4207 = vmatprep.mubr.msk.bf16.mxu0 %vm2714_vm2, %v4414_v1 }
 0x733   : > { %4208 = vmatmul.mubr.msk.bf16.gmra.mxu0 %vm2714_vm2, %v4415_v24 }
 0x734   : > { %4211 = vmatprep.mubr.msk.bf16.mxu0 %vm2714_vm2, %v4416_v42 }
 0x73b   : > { %4212 = vmatmul.mubr.msk.bf16.gmra.mxu0 %vm2714_vm2, %v4417_v32 }
 0x73c   : > { %4215 = vmatprep.mubr.msk.bf16.mxu0 %vm2714_vm2, %v4418_v54 }
 0x743   : > { %4216 = vmatmul.mubr.msk.bf16.gmra.mxu0 %vm2714_vm2, %v4419_v35 }
 0x753   : > { %v4155_v58 = vpop.f32.mrf.mxu0 }
 0x755   : > { %v2501_v23 = vpop.f32.mrf.mxu0 }
 0x757   : > { %v4156_v45 = vpop.f32.mrf.mxu0 }
 0x759   : > { %v2504_v0 = vpop.f32.mrf.mxu0 }
 0x763   : > { %v5338_v3 = vpop.f32.mrf.mxu0 }
 0x765   : > { %v5340_v37 = vpop.f32.mrf.mxu0 }
 0x767   : > { %v5342_v5 = vpop.f32.mrf.mxu0 }
 0x769   : > { %v5344_v41 = vpop.f32.mrf.mxu0 }
 0x773   : > { %v5346_v33 = vpop.f32.mrf.mxu0 }
 0x775   : > { %v5348_v48 = vpop.f32.mrf.mxu0 }
 0x777   : > { %v5350_v19 = vpop.f32.mrf.mxu0 }
 0x779   : > { %v5352_v21 = vpop.f32.mrf.mxu0 }
 0x783   : > { %v5354_v46 = vpop.f32.mrf.mxu0 }
 0x785   : > { %v5356_v27 = vpop.f32.mrf.mxu0 }
 0x787   : > { %v5358_v25 = vpop.f32.mrf.mxu0 }
 0x789   : > { %v5360_v8 = vpop.f32.mrf.mxu0 }
 0x793   : > { %v5362_v20 = vpop.f32.mrf.mxu0 }
 0x795   : > { %v5364_v30 = vpop.f32.mrf.mxu0 }
 0x797   : > { %v5366_v13 = vpop.f32.mrf.mxu0 }
 0x799   : > { %v5368_v11 = vpop.f32.mrf.mxu0 }
 0x7a3   : > { %v5370_v12 = vpop.f32.mrf.mxu0 }
 0x7a5   : > { %v5372_v52 = vpop.f32.mrf.mxu0 }
 0x7a7   : > { %v5381_v36 = vpop.f32.mrf.mxu0 }
 0x7a9   : > { %v5383_v6 = vpop.f32.mrf.mxu0 }
 0x7b3   : > { %v5385_v28 = vpop.f32.mrf.mxu0 }
 0x7b5   : > { %v5387_v15 = vpop.f32.mrf.mxu0 }
 0x7b7   : > { %v5389_v31 = vpop.f32.mrf.mxu0 }
 0x7b9   : > { %v5391_v10 = vpop.f32.mrf.mxu0 }
 0x7c3   : > { %v5393_v50 = vpop.f32.mrf.mxu0 }
 0x7c5   : > { %v5395_v56 = vpop.f32.mrf.mxu0 }
 0x7c7   : > { %v5397_v62 = vpop.f32.mrf.mxu0 }
 0x7c9   : > { %v5402_v22 = vpop.f32.mrf.mxu0 }
 0x7cb   : > { %v4189_v2 = vpop.f32.mrf.mxu0 }
 0x7cc   : > { %v2806_v55 = vadd.f32 %v4189_v2, %v4155_v58 }
 0x7cd   : > { %v2797_v43 = vpop.f32.mrf.mxu0 }
 0x7ce   : > { %v2798_v47 = vadd.f32 %v2797_v43, %v2501_v23  ;;  %v2933_v7 = vadd.f32 %v5407_v34, %v2806_v55 }
 0x7cf   : > { %v4190_v39 = vpop.f32.mrf.mxu0 }
 0x7d0   : > { %v2809_v59 = vadd.f32 %v4190_v39, %v4156_v45  ;;  %v2931_v61 = vadd.f32 %v5407_v34, %v2798_v47  ;;  %v2965_v9 = vmax.f32 %v2933_v7, 0.0 }
 0x7d1   : > { %v2800_v29 = vpop.f32.mrf.mxu0 }
 0x7d2   : > { %v2934_v26 = vadd.f32 %v5407_v34, %v2809_v59  ;;  %v2801_v60 = vadd.f32 %v2800_v29, %v2504_v0  ;;  %v2963_v24 = vmax.f32 %v2931_v61, 0.0 }
 0x7d3   : > { %v4193_v40 = vpop.f32.mrf.mxu0 }
 0x7d4   : > { %v2966_v16 = vmax.f32 %v2934_v26, 0.0  ;;  %v2932_v51 = vadd.f32 %v5407_v34, %v2801_v60  ;;  %v2822_v63 = vadd.f32 %v4193_v40, %v5338_v3 }
 0x7d5   : > { %v2813_v1 = vpop.f32.mrf.mxu0 }
 0x7d6   : > { %v5414_v42 = vpack.c.bf16 %v2966_v16, %v2965_v9  ;;  %v2964_v32 = vmax.f32 %v2932_v51, 0.0  ;;  %v2814_v54 = vadd.f32 %v2813_v1, %v5340_v37  ;;  %v2937_v23 = vadd.f32 %v5407_v34, %v2822_v63 }
 0x7d7   : > { %v4194_v35 = vpop.f32.mrf.mxu0 }
 0x7d8   : > { %v5417_v58 = vpack.c.bf16 %v2964_v32, %v2963_v24  ;;  %v2825_v45 = vadd.f32 %v4194_v35, %v5342_v5  ;;  %v2935_v53 = vadd.f32 %v5407_v34, %v2814_v54  ;;  %v2969_v2 = vmax.f32 %v2937_v23, 0.0 }
 0x7d9   : > { %v2816_v0 = vpop.f32.mrf.mxu0 }
 0x7da   : > { %v2938_v3 = vadd.f32 %v5407_v34, %v2825_v45  ;;  %v2817_v17 = vadd.f32 %v2816_v0, %v5344_v41  ;;  %v2967_v55 = vmax.f32 %v2935_v53, 0.0 }
 0x7db   : > { %v4197_v49 = vpop.f32.mrf.mxu0 }
 0x7dc   : > { %v2970_v14 = vmax.f32 %v2938_v3, 0.0  ;;  %v2936_v37 = vadd.f32 %v5407_v34, %v2817_v17 }
 0x7dd   : > { %v5425_v18 = vpop.f32.mrf.mxu0 }
 0x7de   : > { %v5427_v43 = vpack.c.bf16 %v2970_v14, %v2969_v2  ;;  %v2968_v47 = vmax.f32 %v2936_v37, 0.0 }
 0x7df   : > { %v4198_v39 = vpop.f32.mrf.mxu0 }
 0x7e0   : > { %v5429_v5 = vpack.c.bf16 %v2968_v47, %v2967_v55 }
 0x7e1   : > { %v2832_v38 = vpop.f32.mrf.mxu0 }
 0x7e3   : > { %v4201_v57 = vpop.f32.mrf.mxu0 }
 0x7e4   : > { %v2854_v35 = vadd.f32 %v4201_v57, %v5354_v46 }
 0x7e5   : > { %v2845_v7 = vpop.f32.mrf.mxu0 }
 0x7e7   : > { %v4202_v59 = vpop.f32.mrf.mxu0 }
 0x7e8   : > { %v2857_v24 = vadd.f32 %v4202_v59, %v5358_v25  ;;  %v2945_v25 = vadd.f32 %v5407_v34, %v2854_v35 }
 0x7e9   : > { %v2848_v29 = vpop.f32.mrf.mxu0 }
 0x7ea   : > { %v2946_v0 = vadd.f32 %v5407_v34, %v2857_v24  ;;  %v2849_v53 = vadd.f32 %v2848_v29, %v5360_v8 }
 0x7eb   : > { %v5431_v41 = vpop.f32.mrf.mxu0 }
 0x7ec   : > { %v2978_v47 = vmax.f32 %v2946_v0, 0.0  ;;  %v2944_v57 = vadd.f32 %v5407_v34, %v2849_v53 }
 0x7ed   : > { %v5433_v61 = vpop.f32.mrf.mxu0 }
 0x7ee   : > { %v2976_v35 = vmax.f32 %v2944_v57, 0.0 }
 0x7ef   : > { %v5435_v26 = vpop.f32.mrf.mxu0 }
 0x7f1   : > { %v5437_v60 = vpop.f32.mrf.mxu0 }
 0x7f3   : > { %v4209_v40 = vpop.f32.mrf.mxu0 }
 0x7f4   : > { %v2886_v53 = vadd.f32 %v4209_v40, %v5370_v12 }
 0x7f5   : > { %v5439_v4 = vpop.f32.mrf.mxu0 }
 0x7f6   : > { %v2953_v12 = vadd.f32 %v5407_v34, %v2886_v53 }
 0x7f7   : > { %v4210_v44 = vpop.f32.mrf.mxu0 }
 0x7f9   : > { %v2880_v9 = vpop.f32.mrf.mxu0 }
 0x7fb   : > { %v4213_v16 = vpop.f32.mrf.mxu0 }
 0x7fc   : > { %v2902_v46 = vadd.f32 %v4213_v16, %v5385_v28  ;;  %v2977_v16 = vmax.f32 %v2945_v25, 0.0 }
 0x7fd   : > { %v2893_v51 = vpop.f32.mrf.mxu0 }
 0x7ff   : > { %v4214_v63 = vpop.f32.mrf.mxu0 }
 0x800   : > { %v2905_v3 = vadd.f32 %v4214_v63, %v5389_v31  ;;  %v2841_v31 = vadd.f32 %v4198_v39, %v5350_v19  ;;  %v2894_v19 = vadd.f32 %v2893_v51, %v5387_v15  ;;  %v2830_v15 = vadd.f32 %v5425_v18, %v5348_v48 }
 0x801   : > { %v2896_v1 = vpop.f32.mrf.mxu0  ;;  %v2878_v18 = vadd.f32 %v5439_v4, %v5372_v52 }
 0x802   : > { %v2897_v59 = vadd.f32 %v2896_v1, %v5391_v10  ;;  %v2833_v10 = vadd.f32 %v2832_v38, %v5352_v21  ;;  %v3002_v1 = vpack.c.bf16 %v2978_v47, %v2977_v16  ;;  %v2955_v21 = vadd.f32 %v5407_v34, %v2894_v19  ;;  %v4431_v19 = vld [vmem:[%s5378_s26 + $0x34] ss:$8 sps:$4 sm:$0xff]  }
 0x803   : > { %v4217_v32 = vpop.f32.mrf.mxu0  ;;  %v2939_v48 = vadd.f32 %v5407_v34, %v2830_v15  ;;  %v2985_v47 = vmax.f32 %v2953_v12, 0.0  ;;  %v2951_v57 = vadd.f32 %v5407_v34, %v2878_v18 }
 0x804   : > { %v2918_v54 = vadd.f32 %v4217_v32, %v5393_v50  ;;  %v2846_v50 = vadd.f32 %v2845_v7, %v5356_v27  ;;  %v2838_v7 = vadd.f32 %v4197_v49, %v5346_v33  ;;  %v2956_v33 = vadd.f32 %v5407_v34, %v2897_v59 }
 0x805   : > { %v2909_v23 = vpop.f32.mrf.mxu0  ;;  %v2987_v40 = vmax.f32 %v2955_v21, 0.0 }
 0x806   : > { %v2910_v45 = vadd.f32 %v2909_v23, %v5395_v56  ;;  %v2961_v2 = vadd.f32 %v5407_v34, %v2918_v54  ;;  %v2943_v63 = vadd.f32 %v5407_v34, %v2846_v50  ;;  %v2942_v54 = vadd.f32 %v5407_v34, %v2841_v31 }
 0x807   : > { %v4218_v17 = vpop.f32.mrf.mxu0  ;;  %v2889_v23 = vadd.f32 %v4210_v44, %v5381_v36  ;;  %v2941_v0 = vadd.f32 %v5407_v34, %v2838_v7  ;;  %v2940_v36 = vadd.f32 %v5407_v34, %v2833_v10  ;;  %v2870_v31 = vadd.f32 %v5431_v41, %v5362_v20 }
 0x808   : > { %v2921_v14 = vadd.f32 %v4218_v17, %v5397_v62  ;;  %v2959_v56 = vadd.f32 %v5407_v34, %v2910_v45  ;;  %v2958_v62 = vadd.f32 %v5407_v34, %v2905_v3  ;;  %v2993_v29 = vmax.f32 %v2961_v2, 0.0 }
 0x809   : > { %v2912_v37 = vpop.f32.mrf.mxu0  ;;  %v2975_v51 = vmax.f32 %v2943_v63, 0.0  ;;  %v2974_v38 = vmax.f32 %v2942_v54, 0.0  ;;  %v2954_v17 = vadd.f32 %v5407_v34, %v2889_v23  ;;  %v2881_v2 = vadd.f32 %v2880_v9, %v5383_v6  ;;  %v4423_v63 = vld [vmem:[%s5378_s26 + $0x10] ss:$8 sps:$4 sm:$0xff]  }
 0x80a   : > { %v2962_v55 = vadd.f32 %v5407_v34, %v2921_v14  ;;  %v2913_v8 = vadd.f32 %v2912_v37, %v5402_v22  ;;  %v2957_v22 = vadd.f32 %v5407_v34, %v2902_v46  ;;  %v2991_v39 = vmax.f32 %v2959_v56, 0.0 }
 0x80b   : > { %v2990_v45 = vmax.f32 %v2958_v62, 0.0  ;;  %v3001_v44 = vpack.c.bf16 %v2976_v35, %v2975_v51  ;;  %v2988_v14 = vmax.f32 %v2956_v33, 0.0  ;;  %v2973_v50 = vmax.f32 %v2941_v0, 0.0  ;;  %v3145_v0 = vpop.permute.xlu1 %3144 }
 0x80c   : > { %v2994_v27 = vmax.f32 %v2962_v55, 0.0  ;;  %v2960_v28 = vadd.f32 %v5407_v34, %v2913_v8  ;;  %v2989_v3 = vmax.f32 %v2957_v22, 0.0  ;;  %v2972_v37 = vmax.f32 %v2940_v36, 0.0  ;;  %v4428_v22 = vld [vmem:[%s5378_s26 + $0x24] ss:$8 sps:$4 sm:$0xff]  }
 0x80d   : > { %v3000_v46 = vpack.c.bf16 %v2974_v38, %v2973_v50  ;;  %v2873_v56 = vadd.f32 %v5435_v26, %v5366_v13  ;;  %v2986_v55 = vmax.f32 %v2954_v17, 0.0  ;;  %v2952_v6 = vadd.f32 %v5407_v34, %v2881_v2 }
 0x80e   : > { %v2992_v24 = vmax.f32 %v2960_v28, 0.0  ;;  %v3010_v32 = vpack.c.bf16 %v2994_v27, %v2993_v29  ;;  %v3008_v25 = vpack.c.bf16 %v2990_v45, %v2989_v3  ;;  %v3007_v9 = vpack.c.bf16 %v2988_v14, %v2987_v40 }
 0x80f   : > { %v2971_v8 = vmax.f32 %v2939_v48, 0.0  ;;  %v2950_v4 = vadd.f32 %v5407_v34, %v2873_v56  ;;  %v2865_v62 = vadd.f32 %v5437_v60, %v5368_v11  ;;  %v2984_v13 = vmax.f32 %v2952_v6, 0.0  ;;  %v3150_v36 = vpop.permute.xlu1 %3149 }
 0x810   : > { %3965 = vmatprep.subr.bf16.mxu1 %v3010_v32  ;;  %v3009_v49 = vpack.c.bf16 %v2992_v24, %v2991_v39  ;;  %v3006_v26 = vpack.c.bf16 %v2986_v55, %v2985_v47  ;;  %v2949_v59 = vadd.f32 %v5407_v34, %v2870_v31  ;;  %v2862_v29 = vadd.f32 %v5433_v61, %v5364_v30  ;;  %v4429_v39 = vld [vmem:[%s5378_s26 + $0x30] ss:$8 sps:$4 sm:$0xff]  }
 0x811   : > { %3966 = vmatpush3.bf16.msra.mxu1 %v3002_v1  ;;  %v2999_v52 = vpack.c.bf16 %v2972_v37, %v2971_v8  ;;  %v2983_v27 = vmax.f32 %v2951_v57, 0.0  ;;  %v2982_v20 = vmax.f32 %v2950_v4, 0.0  ;;  %v2948_v41 = vadd.f32 %v5407_v34, %v2865_v62 }
 0x812   : > { %3967 = vmatprep.subr.bf16.mxu1 %v3009_v49  ;;  %v2981_v7 = vmax.f32 %v2949_v59, 0.0  ;;  %v2947_v11 = vadd.f32 %v5407_v34, %v2862_v29  ;;  %v4425_v34 = vld [vmem:[%s5378_s26 + $0x14] ss:$8 sps:$4 sm:$0xff]  }
 0x813   : > { %v3005_v28 = vpack.c.bf16 %v2984_v13, %v2983_v27  ;;  %v2980_v60 = vmax.f32 %v2948_v41, 0.0  ;;  %v3160_v40 = vpop.permute.xlu1 %3159 }
 0x814   : > { %v3004_v16 = vpack.c.bf16 %v2982_v20, %v2981_v7  ;;  %v2979_v30 = vmax.f32 %v2947_v11, 0.0 }
 0x815   : > { %3968 = vmatpush3.bf16.msra.mxu1 %v3001_v44 }
 0x816   : > { %3969 = vmatprep.subr.bf16.mxu1 %v3008_v25  ;;  %v3003_v61 = vpack.c.bf16 %v2980_v60, %v2979_v30 }
 0x817   : > { %v3170_v47 = vpop.permute.xlu1 %3169 }
 0x819   : > { %3970 = vmatpush3.bf16.msra.mxu1 %v3000_v46 }
 0x81a   : > { %3971 = vmatprep.subr.bf16.mxu1 %v3007_v9 }
 0x81d   : > { %3972 = vmatpush3.bf16.msra.mxu1 %v2999_v52 }
 0x81e   : > { %3973 = vmatprep.subr.bf16.mxu1 %v3006_v26 }
 0x821   : > { %3974 = vmatpush3.bf16.msra.mxu1 %v5427_v43  ;;  %v4420_v43 = vld [vmem:[%s5378_s26] ss:$8 sps:$4 sm:$0xff]  }
 0x822   : > { %3975 = vmatprep.subr.bf16.mxu1 %v3005_v28 }
 0x825   : > { %3976 = vmatpush3.bf16.msra.mxu1 %v5429_v5  ;;  %v4426_v5 = vld [vmem:[%s5378_s26 + $0x20] ss:$8 sps:$4 sm:$0xff]   ;;  %s3189_s26 = scalar_lea.sflag [#allocation4], %s4689_s30 }
 0x826   : > { %3977 = vmatprep.subr.bf16.mxu1 %v3004_v16 }
 0x829   : > { %3978 = vmatpush3.bf16.msra.mxu1 %v5414_v42  ;;  %v3135_v42 = vpop.permute.xlu0 %3134 }
 0x82a   : > { %3979 = vmatprep.subr.bf16.mxu1 %v3003_v61 }
 0x82d   : > { %3980 = vmatpush3.bf16.msra.mxu1 %v5417_v58  ;;  %v3140_v35 = vpop.permute.xlu0 %3139 }
 0x830   : > { %3092 = vmatmul.mubr.bf16.vlgmr.msra.gmra.mxu1 %v4420_v43 }
 0x831   : > { %3099 = vmatprep.mubr.bf16.mxu1 %v4425_v34  ;;  %v3155_v25 = vpop.permute.xlu0 %3154 }
 0x835   : > { %v3165_v6 = vpop.permute.xlu0 %3164 }
 0x838   : > { %3100 = vmatmul.mubr.bf16.gmra.mxu1 %v4423_v63 }
 0x839   : > { %3107 = vmatprep.mubr.bf16.mxu1 %v4428_v22 }
 0x840   : > { %3108 = vmatmul.mubr.bf16.gmra.mxu1 %v4426_v5 }
 0x841   : > { %3115 = vmatprep.mubr.bf16.mxu1 %v4431_v19 }
 0x848   : > { %3116 = vmatmul.mubr.bf16.gmra.mxu1 %v4429_v39 }
 0x8f0   : > { %v3981_v24 = vpop.f32.mrf.mxu1 }
 0x8f2   : > { %v3982_v32 = vpop.f32.mrf.mxu1 }
 0x8f3   : > { %v3983_v54 = vadd.f32 %v3982_v32, %v3981_v24 }
 0x8f4   : > { %v3984_v58 = vpop.f32.mrf.mxu1 }
 0x8f5   : > { %v3172_v10 = vmul.f32 %v3983_v54, %v3135_v42 }
 0x8f6   : > { %v3985_v1 = vpop.f32.mrf.mxu1 }
 0x8f7   : > { %v3986_v23 = vadd.f32 %v3985_v1, %v3984_v58  ;;  %3180 = vst [vmem:[%s5507_s28] sm:$0xff] %v3172_v10 }
 0x8f8   : > { %v3987_v45 = vpop.f32.mrf.mxu1 }
 0x8f9   : > { %v3173_v33 = vmul.f32 %v3986_v23, %v3140_v35 }
 0x8fa   : > { %v3988_v49 = vpop.f32.mrf.mxu1 }
 0x8fb   : > { %v3989_v15 = vadd.f32 %v3988_v49, %v3987_v45  ;;  %3181 = vst [vmem:[%s5507_s28 + $0x8] sm:$0xff] %v3173_v33 }
 0x8fc   : > { %v3990_v51 = vpop.f32.mrf.mxu1 }
 0x8fd   : > { %v3174_v53 = vmul.f32 %v3989_v15, %v3145_v0 }
 0x8fe   : > { %v3991_v3 = vpop.f32.mrf.mxu1 }
 0x8ff   : > { %v3992_v21 = vadd.f32 %v3991_v3, %v3990_v51  ;;  %3182 = vst [vmem:[%s5507_s28 + $0x10] sm:$0xff] %v3174_v53 }
 0x900   : > { %v3993_v38 = vpop.f32.mrf.mxu1 }
 0x901   : > { %v3175_v44 = vmul.f32 %v3992_v21, %v3150_v36 }
 0x902   : > { %v3994_v17 = vpop.f32.mrf.mxu1 }
 0x903   : > { %v3995_v2 = vadd.f32 %v3994_v17, %v3993_v38  ;;  %3183 = vst [vmem:[%s5507_s28 + $0x18] sm:$0xff] %v3175_v44 }
 0x904   : > { %v3996_v14 = vpop.f32.mrf.mxu1 }
 0x905   : > { %v3176_v50 = vmul.f32 %v3995_v2, %v3155_v25 }
 0x906   : > { %v3997_v48 = vpop.f32.mrf.mxu1 }
 0x907   : > { %v3998_v12 = vadd.f32 %v3997_v48, %v3996_v14  ;;  %3184 = vst [vmem:[%s5507_s28 + $0x20] sm:$0xff] %v3176_v50 }
 0x908   : > { %v3999_v18 = vpop.f32.mrf.mxu1 }
 0x909   : > { %v3177_v46 = vmul.f32 %v3998_v12, %v3160_v40 }
 0x90a   : > { %v4000_v37 = vpop.f32.mrf.mxu1 }
 0x90b   : > { %v4001_v56 = vadd.f32 %v4000_v37, %v3999_v18  ;;  %3185 = vst [vmem:[%s5507_s28 + $0x28] sm:$0xff] %v3177_v46 }
 0x90c   : > { %v4002_v55 = vpop.f32.mrf.mxu1 }
 0x90d   : > { %v3178_v9 = vmul.f32 %v4001_v56, %v3165_v6 }
 0x90e   : > { %v4003_v8 = vpop.f32.mrf.mxu1 }
 0x90f   : > { %v4004_v31 = vadd.f32 %v4003_v8, %v4002_v55  ;;  %3186 = vst [vmem:[%s5507_s28 + $0x30] sm:$0xff] %v3178_v9 }
 0x911   : > { %v3179_v57 = vmul.f32 %v4004_v31, %v3170_v47 }
 0x913   : > { %3187 = vst [vmem:[%s5507_s28 + $0x38] sm:$0xff] %v3179_v57 }
 0x914   : > { %4473 = shalt.err (!%p4470_p13)
}
 0x915   : > { %s4474_s25 = scalar_lea.hbm %s5523_s14, 1024  ;;  %s4478_s28 = scalar_lea.hbm %s5577_s11, 4096 }
 0x916   : > { %p4475_p1 = scmp.ne.s32.totalorder %s5523_s14, %s4474_s25  ;;  %p4479_p3 = scmp.lt.s32.totalorder %s5523_s14, %s5577_s11 }
 0x917   : > { %p4480_p6 = scmp.lt.s32.totalorder %s4478_s28, %s4474_s25 }
 0x918   : > { %p4476_p0 = pnand %p4475_p1, %p5719_p12 }
 0x919   : > { %p4481_p10 = por %p4480_p6, %p4479_p3 }
 0x91a   : > { %p4477_p2 = pneg %p4476_p0 }
 0x91c   : > { %p4482_p11 = pnand %p4481_p10, %p4477_p2 }
 0x91e   : > { %4485 = shalt.err (!%p4482_p11)
}
 0x91f   : > { %s4531_s27 = smov 128   ;;  %s4532_s19 = smov 8  }
 0x920   : > { %4222 = dma.vmem_to_hbm [thread:$0]  (%p5719_p12), %s5517_s23, 1024, %s5523_s14, %s3189_s26, %s4531_s27, %s4531_s27, %s4532_s19  }
 0x921 PF: > { %s5720_s21 = sld [smem:[#allocation11_spill]]  ;;  %p4233_p4 = scmp.ge.s32.totalorder %s4524_s20, 2 }
 0x922   : > { %s3217_s22 = sand.u32 1, %s4512_s17  }
 0x923   : > { %s3218_s24 = scalar_lea.sflag [#allocation4], %s3217_s22 }
 0x927   : > { %p5721_p5 = scmp.ne.s32.totalorder %s5720_s21, 0 }
 0x929   : > { %p4229_p7 = pnand %p4233_p4, %p5721_p5 }
 0x92b   : > { %p4230_p8 = pneg %p4229_p7 }
 0x92d   : > { %4507 = dma.done.wait (%p4230_p8), %s3218_s24, 1024  }
 0x92e   : > { %4509 = vsyncadd (%p4230_p8), %s3218_s24, 4294966272  ;;  %s5722_s20 = sld [smem:[#allocation9_spill]]  ;;  %s5725_s17 = smov %s4516_s18 }
 0x92f   : > { %s5723_s25 = sld [smem:[#allocation8_spill]] }
 0x930   : > { %s5724_s19 = sld [smem:[#allocation10_spill]] }
 0x934   : > { %p24_p9 = scmp.ge.s32.totalorder %s5722_s20, 6  }
 0x935   : > { %s5726_s18 = smov %s5723_s25 }
 0x936   :  { %26 = sbr.rel (!%p24_p9) target bundleno = 5 (0x5), region = 124 }
 0x93b   :  { %3223 = vsyncpa [#allocation3], 1 }
 0x93c   :  { %3225 = vsyncpa [#allocation3 + $0x1], 1 }
 0x93d   :  { %3226 = vsyncpa [#allocation4], 1 }
 0x93e   :  { %3228 = vsyncpa [#allocation4 + $0x1], 1 }

</bundles_post_ra>
